<compile_context>
chip_gen: v7x
topology: tpu7x:2x2x1
jax: 0.10.0
libtpu: 0.0.40
codegen_flags: <defaults>
</compile_context>

<pallas_src>
import jax
import jax.numpy as jnp
from jax.experimental import pallas as pl
from jax.experimental.pallas import tpu as pltpu


_VMEM_LIMIT = 32 * 1024 * 1024  # comfortably fits v5e/v6e (128 MiB) and v7x (64 MiB)


def _compiler_params():
    return pltpu.CompilerParams(
        dimension_semantics=("parallel",),
        vmem_limit_bytes=_VMEM_LIMIT,
    )


# ---------------------------------------------------------------------------
# Pallas kernels
# ---------------------------------------------------------------------------
def _conv_pool_kernel(p_ref, w_ref, b_ref, o_ref):
    """Fused conv (im2col matmul) + bias + 2x2 max-pool + ReLU.

    p_ref: (4, TM, K) bf16  -- patch rows for the 4 positions of each pool window
    w_ref: (K, N)     bf16  -- resident conv weights (K = 9*Cin, N = Cout)
    b_ref: (1, N)     f32
    o_ref: (TM, N)          -- pooled activation
    """
    w = w_ref[...]
    b = b_ref[...]
    y = None
    for c in range(4):  # the 4 pool-window candidates share the weight tile
        acc = jnp.dot(p_ref[c], w, preferred_element_type=jnp.float32) + b
        y = acc if y is None else jnp.maximum(y, acc)
    # ReLU commutes with max, so apply it once after pooling.
    o_ref[...] = jnp.maximum(y, 0.0).astype(o_ref.dtype)


def _fc_kernel(x_ref, w_ref, b_ref, o_ref):
    """(TM, K) @ (K, N) + bias; N is lane-padded to 128 for dense stores."""
    o_ref[...] = (
        jnp.dot(x_ref[...], w_ref[...], preferred_element_type=jnp.float32)
        + b_ref[...]
    )


# ---------------------------------------------------------------------------
# pallas_call wrappers
# ---------------------------------------------------------------------------
def _pick_tm(m, cap):
    # Block second-to-last dim must be a multiple of 8 OR equal the full dim.
    # m <= cap  -> use the full dim (always legal);  m > cap -> cap (mult of 8).
    return m if m <= cap else cap


def conv_pool(cands, w, b, *, out_dtype=jnp.bfloat16):
    _, m, k = cands.shape
    n = w.shape[1]
    tm = _pick_tm(m, 512)
    return pl.pallas_call(
        _conv_pool_kernel,
        out_shape=jax.ShapeDtypeStruct((m, n), out_dtype),
        grid_spec=pltpu.PrefetchScalarGridSpec(
            num_scalar_prefetch=0,
            grid=(pl.cdiv(m, tm),),
            in_specs=[
                pl.BlockSpec((4, tm, k), lambda i: (0, i, 0)),
                pl.BlockSpec((k, n), lambda i: (0, 0)),   # weights resident
                pl.BlockSpec((1, n), lambda i: (0, 0)),   # bias resident
            ],
            out_specs=pl.BlockSpec((tm, n), lambda i: (i, 0)),
        ),
        compiler_params=_compiler_params(),
    )(cands, w, b)


def fc(x, w, b):
    m, k = x.shape
    n = w.shape[1]
    tm = _pick_tm(m, 256)
    return pl.pallas_call(
        _fc_kernel,
        out_shape=jax.ShapeDtypeStruct((m, n), jnp.float32),
        grid_spec=pltpu.PrefetchScalarGridSpec(
            num_scalar_prefetch=0,
            grid=(pl.cdiv(m, tm),),
            in_specs=[
                pl.BlockSpec((tm, k), lambda i: (i, 0)),
                pl.BlockSpec((k, n), lambda i: (0, 0)),
                pl.BlockSpec((1, n), lambda i: (0, 0)),
            ],
            out_specs=pl.BlockSpec((tm, n), lambda i: (i, 0)),
        ),
        compiler_params=_compiler_params(),
    )(x.astype(jnp.bfloat16), w, b)


# ---------------------------------------------------------------------------
# XLA-side glue: pooled im2col candidates
# ---------------------------------------------------------------------------
def pool_conv_candidates(x, hp, wp):
    """For a 3x3 valid conv followed by 2x2/stride-2 max-pool: im2col patch rows
    for the 4 positions (di, dj) of every pool window.

    x: (B, H, W, C)  ->  (4, B*hp*wp, 9*C) bf16, column order (kh, kw, cin).
    """
    b = x.shape[0]
    c = x.shape[3]
    cands = []
    for di in range(2):
        for dj in range(2):
            taps = []
            for ki in range(3):
                for kj in range(3):
                    taps.append(
                        x[:, di + ki: di + ki + 2 * hp - 1: 2,
                             dj + kj: dj + kj + 2 * wp - 1: 2, :]
                    )  # (B, hp, wp, C)
            patch = jnp.concatenate(taps, axis=-1)           # (B, hp, wp, 9*C)
            cands.append(patch.reshape(b * hp * wp, 9 * c))
    return jnp.stack(cands, axis=0).astype(jnp.bfloat16)


# ---------------------------------------------------------------------------
# Parameters and forward pass
# ---------------------------------------------------------------------------
def init_params(key):
    """Deterministic synthetic params, shapes from CNNModel.__init__.

    Conv weights stored as (9*Cin, Cout) matmul matrices in (kh, kw, cin) row
    order (torch OIHW -> HWIO -> reshape); fc1 rows permuted from torch's
    (C,H,W) flatten order to (H,W,C), zero-padded to 128 output lanes.
    """
    ks = jax.random.split(key, 6)

    def u(k, shape, fan_in):
        bound = 1.0 / jnp.sqrt(jnp.float32(fan_in))
        return jax.random.uniform(k, shape, jnp.float32, -bound, bound)

    w1 = u(ks[0], (3, 3, 1, 16), 9)            # cnn1: 1 -> 16, 3x3 (HWIO)
    b1 = u(ks[1], (16,), 9)
    w2 = u(ks[2], (3, 3, 16, 32), 144)         # cnn2: 16 -> 32, 3x3 (HWIO)
    b2 = u(ks[3], (32,), 144)
    wfc = u(ks[4], (32 * 5 * 5, 10), 800)      # rows in torch (C,H,W) flatten order
    bfc = u(ks[5], (10,), 800)

    # (C,H,W) -> (H,W,C) row permutation so the NHWC flatten feeds fc1 directly.
    wfc_hwc = wfc.reshape(32, 5, 5, 10).transpose(1, 2, 0, 3).reshape(800, 10)
    wfc_pad = jnp.zeros((800, 128), jnp.float32).at[:, :10].set(wfc_hwc)
    bfc_pad = jnp.zeros((1, 128), jnp.float32).at[:, :10].set(bfc)

    return dict(
        w1=w1.reshape(9, 16).astype(jnp.bfloat16),
        b1=b1.reshape(1, 16),
        w2=w2.reshape(9 * 16, 32).astype(jnp.bfloat16),
        b2=b2.reshape(1, 32),
        wfc=wfc_pad.astype(jnp.bfloat16),
        bfc=bfc_pad,
    )


def cnn_forward(params, x_nchw):
    b = x_nchw.shape[0]
    # cin == 1, so NCHW -> NHWC is a pure reshape (no data movement).
    x = x_nchw.reshape(b, 28, 28, 1)

    # conv1(1->16) + ReLU + maxpool2 : (B,28,28,1) -> (B,13,13,16)
    c1 = pool_conv_candidates(x, 13, 13)                 # (4, B*169, 9)
    p1 = conv_pool(c1, params["w1"], params["b1"])       # (B*169, 16) bf16
    p1 = p1.reshape(b, 13, 13, 16)

    # conv2(16->32) + ReLU + maxpool2 : (B,13,13,16) -> (B,5,5,32)
    c2 = pool_conv_candidates(p1, 5, 5)                  # (4, B*25, 144)
    p2 = conv_pool(c2, params["w2"], params["b2"])       # (B*25, 32) bf16

    # fc1: activation flatten is (H,W,C); wfc rows were permuted at init to match.
    flat = p2.reshape(b, 32 * 5 * 5)                     # (B, 800) — contiguous view
    logits = fc(flat, params["wfc"], params["bfc"])      # (B, 128) lane-dense
    return logits[:, :10]


if __name__ == "__main__":
    key = jax.random.PRNGKey(0)
    pkey, xkey = jax.random.split(key)
    params = init_params(pkey)
    # batch=2; spatial must be 28x28 so fc1's 32*5*5 input size holds
    x = jax.random.normal(xkey, (2, 1, 28, 28), jnp.float32)
    out = jax.jit(cnn_forward)(params, x)
    jax.block_until_ready(out)
    assert out.shape == (2, 10)
    assert out.dtype == jnp.float32
    print("KERNEL_OK")
</pallas_src>

<mosaic_0001>
module attributes {stable_mosaic.version = 11 : i64} {
  func.func @_conv_pool_kernel(%arg0: i32, %arg1: memref<4x338x9xbf16, #tpu.memory_space<vmem>>, %arg2: memref<9x16xbf16, #tpu.memory_space<vmem>>, %arg3: memref<1x16xf32, #tpu.memory_space<vmem>>, %arg4: memref<338x16xbf16, #tpu.memory_space<vmem>>) attributes {dimension_semantics = [#tpu.dimension_semantics<parallel>], iteration_bounds = array<i64: 1>, scalar_prefetch = 0 : i64, scratch_operands = 0 : i64, tpu.core_type = #tpu.core_type<tc>, window_params = [{transform_indices = @transform_0, window_bounds = array<i64: 4, 338, 9>}, {pipeline_mode = #tpu.pipeline_mode<synchronous>, transform_indices = @transform_1, window_bounds = array<i64: 9, 16>}, {pipeline_mode = #tpu.pipeline_mode<synchronous>, transform_indices = @transform_2, window_bounds = array<i64: 1, 16>}, {transform_indices = @transform_3, window_bounds = array<i64: 338, 16>}]} {
    %c0 = arith.constant 0 : index
    %c0_0 = arith.constant 0 : index
    %0 = vector.load %arg2[%c0, %c0_0] : memref<9x16xbf16, #tpu.memory_space<vmem>>, vector<9x16xbf16>
    %c0_1 = arith.constant 0 : index
    %c0_2 = arith.constant 0 : index
    %1 = vector.load %arg3[%c0_1, %c0_2] : memref<1x16xf32, #tpu.memory_space<vmem>>, vector<1x16xf32>
    %c0_3 = arith.constant 0 : index
    %c0_4 = arith.constant 0 : index
    %c0_5 = arith.constant 0 : index
    %2 = vector.load %arg1[%c0_3, %c0_4, %c0_5] : memref<4x338x9xbf16, #tpu.memory_space<vmem>>, vector<1x338x9xbf16>
    %3 = vector.shape_cast %2 : vector<1x338x9xbf16> to vector<338x9xbf16>
    %cst = arith.constant dense<0.000000e+00> : vector<338x16xf32>
    %4 = tpu.matmul %3, %0, %cst {dimension_numbers = #tpu.dot_dimension_numbers<[1], [0], [0], [1], [0, 0, 1, 1], [], []>} : vector<338x9xbf16>, vector<9x16xbf16>, vector<338x16xf32> -> vector<338x16xf32>
    %5 = vector.broadcast %1 : vector<1x16xf32> to vector<338x16xf32>
    %6 = arith.addf %4, %5 : vector<338x16xf32>
    %c1 = arith.constant 1 : index
    %c0_6 = arith.constant 0 : index
    %c0_7 = arith.constant 0 : index
    %7 = vector.load %arg1[%c1, %c0_6, %c0_7] : memref<4x338x9xbf16, #tpu.memory_space<vmem>>, vector<1x338x9xbf16>
    %8 = vector.shape_cast %7 : vector<1x338x9xbf16> to vector<338x9xbf16>
    %cst_8 = arith.constant dense<0.000000e+00> : vector<338x16xf32>
    %9 = tpu.matmul %8, %0, %cst_8 {dimension_numbers = #tpu.dot_dimension_numbers<[1], [0], [0], [1], [0, 0, 1, 1], [], []>} : vector<338x9xbf16>, vector<9x16xbf16>, vector<338x16xf32> -> vector<338x16xf32>
    %10 = vector.broadcast %1 : vector<1x16xf32> to vector<338x16xf32>
    %11 = arith.addf %9, %10 : vector<338x16xf32>
    %12 = arith.maximumf %6, %11 : vector<338x16xf32>
    %c2 = arith.constant 2 : index
    %c0_9 = arith.constant 0 : index
    %c0_10 = arith.constant 0 : index
    %13 = vector.load %arg1[%c2, %c0_9, %c0_10] : memref<4x338x9xbf16, #tpu.memory_space<vmem>>, vector<1x338x9xbf16>
    %14 = vector.shape_cast %13 : vector<1x338x9xbf16> to vector<338x9xbf16>
    %cst_11 = arith.constant dense<0.000000e+00> : vector<338x16xf32>
    %15 = tpu.matmul %14, %0, %cst_11 {dimension_numbers = #tpu.dot_dimension_numbers<[1], [0], [0], [1], [0, 0, 1, 1], [], []>} : vector<338x9xbf16>, vector<9x16xbf16>, vector<338x16xf32> -> vector<338x16xf32>
    %16 = vector.broadcast %1 : vector<1x16xf32> to vector<338x16xf32>
    %17 = arith.addf %15, %16 : vector<338x16xf32>
    %18 = arith.maximumf %12, %17 : vector<338x16xf32>
    %c3 = arith.constant 3 : index
    %c0_12 = arith.constant 0 : index
    %c0_13 = arith.constant 0 : index
    %19 = vector.load %arg1[%c3, %c0_12, %c0_13] : memref<4x338x9xbf16, #tpu.memory_space<vmem>>, vector<1x338x9xbf16>
    %20 = vector.shape_cast %19 : vector<1x338x9xbf16> to vector<338x9xbf16>
    %cst_14 = arith.constant dense<0.000000e+00> : vector<338x16xf32>
    %21 = tpu.matmul %20, %0, %cst_14 {dimension_numbers = #tpu.dot_dimension_numbers<[1], [0], [0], [1], [0, 0, 1, 1], [], []>} : vector<338x9xbf16>, vector<9x16xbf16>, vector<338x16xf32> -> vector<338x16xf32>
    %22 = vector.broadcast %1 : vector<1x16xf32> to vector<338x16xf32>
    %23 = arith.addf %21, %22 : vector<338x16xf32>
    %24 = arith.maximumf %18, %23 : vector<338x16xf32>
    %cst_15 = arith.constant 0.000000e+00 : f32
    %25 = vector.broadcast %cst_15 : f32 to vector<338x16xf32>
    %26 = arith.maximumf %24, %25 : vector<338x16xf32>
    %27 = arith.truncf %26 : vector<338x16xf32> to vector<338x16xbf16>
    %c0_16 = arith.constant 0 : index
    %c0_17 = arith.constant 0 : index
    %28 = vector.load %arg4[%c0_16, %c0_17] : memref<338x16xbf16, #tpu.memory_space<vmem>>, vector<338x16xbf16>
    tpu.vector_store %arg4[%c0_16, %c0_17], %27 {strides = array<i32>} : memref<338x16xbf16, #tpu.memory_space<vmem>>, vector<338x16xbf16>,
    return
  }
  func.func @transform_0(%arg0: i32) -> (i32, i32, i32) {
    %c0_i32 = arith.constant 0 : i32
    %c0_i32_0 = arith.constant 0 : i32
    %c0_i32_1 = arith.constant 0 : i32
    return %c0_i32, %arg0, %c0_i32_0 : i32, i32, i32
  }
  func.func @transform_1(%arg0: i32) -> (i32, i32) {
    %c0_i32 = arith.constant 0 : i32
    %c0_i32_0 = arith.constant 0 : i32
    %c0_i32_1 = arith.constant 0 : i32
    return %c0_i32, %c0_i32_0 : i32, i32
  }
  func.func @transform_2(%arg0: i32) -> (i32, i32) {
    %c0_i32 = arith.constant 0 : i32
    %c0_i32_0 = arith.constant 0 : i32
    %c0_i32_1 = arith.constant 0 : i32
    return %c0_i32, %c0_i32_0 : i32, i32
  }
  func.func @transform_3(%arg0: i32) -> (i32, i32) {
    %c0_i32 = arith.constant 0 : i32
    %c0_i32_0 = arith.constant 0 : i32
    return %arg0, %c0_i32 : i32, i32
  }
}

module attributes {stable_mosaic.version = 11 : i64} {
  func.func @_fc_kernel(%arg0: i32, %arg1: memref<2x800xbf16, #tpu.memory_space<vmem>>, %arg2: memref<800x128xbf16, #tpu.memory_space<vmem>>, %arg3: memref<1x128xf32, #tpu.memory_space<vmem>>, %arg4: memref<2x128xf32, #tpu.memory_space<vmem>>) attributes {dimension_semantics = [#tpu.dimension_semantics<parallel>], iteration_bounds = array<i64: 1>, scalar_prefetch = 0 : i64, scratch_operands = 0 : i64, tpu.core_type = #tpu.core_type<tc>, window_params = [{transform_indices = @transform_0, window_bounds = array<i64: 2, 800>}, {pipeline_mode = #tpu.pipeline_mode<synchronous>, transform_indices = @transform_1, window_bounds = array<i64: 800, 128>}, {pipeline_mode = #tpu.pipeline_mode<synchronous>, transform_indices = @transform_2, window_bounds = array<i64: 1, 128>}, {transform_indices = @transform_3, window_bounds = array<i64: 2, 128>}]} {
    %c0 = arith.constant 0 : index
    %c0_0 = arith.constant 0 : index
    %0 = vector.load %arg1[%c0, %c0_0] : memref<2x800xbf16, #tpu.memory_space<vmem>>, vector<2x800xbf16>
    %c0_1 = arith.constant 0 : index
    %c0_2 = arith.constant 0 : index
    %1 = vector.load %arg2[%c0_1, %c0_2] : memref<800x128xbf16, #tpu.memory_space<vmem>>, vector<800x128xbf16>
    %cst = arith.constant dense<0.000000e+00> : vector<2x128xf32>
    %2 = tpu.matmul %0, %1, %cst {dimension_numbers = #tpu.dot_dimension_numbers<[1], [0], [0], [1], [0, 0, 1, 1], [], []>} : vector<2x800xbf16>, vector<800x128xbf16>, vector<2x128xf32> -> vector<2x128xf32>
    %c0_3 = arith.constant 0 : index
    %c0_4 = arith.constant 0 : index
    %3 = vector.load %arg3[%c0_3, %c0_4] : memref<1x128xf32, #tpu.memory_space<vmem>>, vector<1x128xf32>
    %4 = vector.broadcast %3 : vector<1x128xf32> to vector<2x128xf32>
    %5 = arith.addf %2, %4 : vector<2x128xf32>
    %c0_5 = arith.constant 0 : index
    %c0_6 = arith.constant 0 : index
    %6 = vector.load %arg4[%c0_5, %c0_6] : memref<2x128xf32, #tpu.memory_space<vmem>>, vector<2x128xf32>
    tpu.vector_store %arg4[%c0_5, %c0_6], %5 {strides = array<i32>} : memref<2x128xf32, #tpu.memory_space<vmem>>, vector<2x128xf32>,
    return
  }
  func.func @transform_0(%arg0: i32) -> (i32, i32) {
    %c0_i32 = arith.constant 0 : i32
    %c0_i32_0 = arith.constant 0 : i32
    return %arg0, %c0_i32 : i32, i32
  }
  func.func @transform_1(%arg0: i32) -> (i32, i32) {
    %c0_i32 = arith.constant 0 : i32
    %c0_i32_0 = arith.constant 0 : i32
    %c0_i32_1 = arith.constant 0 : i32
    return %c0_i32, %c0_i32_0 : i32, i32
  }
  func.func @transform_2(%arg0: i32) -> (i32, i32) {
    %c0_i32 = arith.constant 0 : i32
    %c0_i32_0 = arith.constant 0 : i32
    %c0_i32_1 = arith.constant 0 : i32
    return %c0_i32, %c0_i32_0 : i32, i32
  }
  func.func @transform_3(%arg0: i32) -> (i32, i32) {
    %c0_i32 = arith.constant 0 : i32
    %c0_i32_0 = arith.constant 0 : i32
    return %arg0, %c0_i32 : i32, i32
  }
}

module attributes {stable_mosaic.version = 11 : i64} {
  func.func @_conv_pool_kernel(%arg0: i32, %arg1: memref<4x50x144xbf16, #tpu.memory_space<vmem>>, %arg2: memref<144x32xbf16, #tpu.memory_space<vmem>>, %arg3: memref<1x32xf32, #tpu.memory_space<vmem>>, %arg4: memref<50x32xbf16, #tpu.memory_space<vmem>>) attributes {dimension_semantics = [#tpu.dimension_semantics<parallel>], iteration_bounds = array<i64: 1>, scalar_prefetch = 0 : i64, scratch_operands = 0 : i64, tpu.core_type = #tpu.core_type<tc>, window_params = [{transform_indices = @transform_0, window_bounds = array<i64: 4, 50, 144>}, {pipeline_mode = #tpu.pipeline_mode<synchronous>, transform_indices = @transform_1, window_bounds = array<i64: 144, 32>}, {pipeline_mode = #tpu.pipeline_mode<synchronous>, transform_indices = @transform_2, window_bounds = array<i64: 1, 32>}, {transform_indices = @transform_3, window_bounds = array<i64: 50, 32>}]} {
    %c0 = arith.constant 0 : index
    %c0_0 = arith.constant 0 : index
    %0 = vector.load %arg2[%c0, %c0_0] : memref<144x32xbf16, #tpu.memory_space<vmem>>, vector<144x32xbf16>
    %c0_1 = arith.constant 0 : index
    %c0_2 = arith.constant 0 : index
    %1 = vector.load %arg3[%c0_1, %c0_2] : memref<1x32xf32, #tpu.memory_space<vmem>>, vector<1x32xf32>
    %c0_3 = arith.constant 0 : index
    %c0_4 = arith.constant 0 : index
    %c0_5 = arith.constant 0 : index
    %2 = vector.load %arg1[%c0_3, %c0_4, %c0_5] : memref<4x50x144xbf16, #tpu.memory_space<vmem>>, vector<1x50x144xbf16>
    %3 = vector.shape_cast %2 : vector<1x50x144xbf16> to vector<50x144xbf16>
    %cst = arith.constant dense<0.000000e+00> : vector<50x32xf32>
    %4 = tpu.matmul %3, %0, %cst {dimension_numbers = #tpu.dot_dimension_numbers<[1], [0], [0], [1], [0, 0, 1, 1], [], []>} : vector<50x144xbf16>, vector<144x32xbf16>, vector<50x32xf32> -> vector<50x32xf32>
    %5 = vector.broadcast %1 : vector<1x32xf32> to vector<50x32xf32>
    %6 = arith.addf %4, %5 : vector<50x32xf32>
    %c1 = arith.constant 1 : index
    %c0_6 = arith.constant 0 : index
    %c0_7 = arith.constant 0 : index
    %7 = vector.load %arg1[%c1, %c0_6, %c0_7] : memref<4x50x144xbf16, #tpu.memory_space<vmem>>, vector<1x50x144xbf16>
    %8 = vector.shape_cast %7 : vector<1x50x144xbf16> to vector<50x144xbf16>
    %cst_8 = arith.constant dense<0.000000e+00> : vector<50x32xf32>
    %9 = tpu.matmul %8, %0, %cst_8 {dimension_numbers = #tpu.dot_dimension_numbers<[1], [0], [0], [1], [0, 0, 1, 1], [], []>} : vector<50x144xbf16>, vector<144x32xbf16>, vector<50x32xf32> -> vector<50x32xf32>
    %10 = vector.broadcast %1 : vector<1x32xf32> to vector<50x32xf32>
    %11 = arith.addf %9, %10 : vector<50x32xf32>
    %12 = arith.maximumf %6, %11 : vector<50x32xf32>
    %c2 = arith.constant 2 : index
    %c0_9 = arith.constant 0 : index
    %c0_10 = arith.constant 0 : index
    %13 = vector.load %arg1[%c2, %c0_9, %c0_10] : memref<4x50x144xbf16, #tpu.memory_space<vmem>>, vector<1x50x144xbf16>
    %14 = vector.shape_cast %13 : vector<1x50x144xbf16> to vector<50x144xbf16>
    %cst_11 = arith.constant dense<0.000000e+00> : vector<50x32xf32>
    %15 = tpu.matmul %14, %0, %cst_11 {dimension_numbers = #tpu.dot_dimension_numbers<[1], [0], [0], [1], [0, 0, 1, 1], [], []>} : vector<50x144xbf16>, vector<144x32xbf16>, vector<50x32xf32> -> vector<50x32xf32>
    %16 = vector.broadcast %1 : vector<1x32xf32> to vector<50x32xf32>
    %17 = arith.addf %15, %16 : vector<50x32xf32>
    %18 = arith.maximumf %12, %17 : vector<50x32xf32>
    %c3 = arith.constant 3 : index
    %c0_12 = arith.constant 0 : index
    %c0_13 = arith.constant 0 : index
    %19 = vector.load %arg1[%c3, %c0_12, %c0_13] : memref<4x50x144xbf16, #tpu.memory_space<vmem>>, vector<1x50x144xbf16>
    %20 = vector.shape_cast %19 : vector<1x50x144xbf16> to vector<50x144xbf16>
    %cst_14 = arith.constant dense<0.000000e+00> : vector<50x32xf32>
    %21 = tpu.matmul %20, %0, %cst_14 {dimension_numbers = #tpu.dot_dimension_numbers<[1], [0], [0], [1], [0, 0, 1, 1], [], []>} : vector<50x144xbf16>, vector<144x32xbf16>, vector<50x32xf32> -> vector<50x32xf32>
    %22 = vector.broadcast %1 : vector<1x32xf32> to vector<50x32xf32>
    %23 = arith.addf %21, %22 : vector<50x32xf32>
    %24 = arith.maximumf %18, %23 : vector<50x32xf32>
    %cst_15 = arith.constant 0.000000e+00 : f32
    %25 = vector.broadcast %cst_15 : f32 to vector<50x32xf32>
    %26 = arith.maximumf %24, %25 : vector<50x32xf32>
    %27 = arith.truncf %26 : vector<50x32xf32> to vector<50x32xbf16>
    %c0_16 = arith.constant 0 : index
    %c0_17 = arith.constant 0 : index
    %28 = vector.load %arg4[%c0_16, %c0_17] : memref<50x32xbf16, #tpu.memory_space<vmem>>, vector<50x32xbf16>
    tpu.vector_store %arg4[%c0_16, %c0_17], %27 {strides = array<i32>} : memref<50x32xbf16, #tpu.memory_space<vmem>>, vector<50x32xbf16>,
    return
  }
  func.func @transform_0(%arg0: i32) -> (i32, i32, i32) {
    %c0_i32 = arith.constant 0 : i32
    %c0_i32_0 = arith.constant 0 : i32
    %c0_i32_1 = arith.constant 0 : i32
    return %c0_i32, %arg0, %c0_i32_0 : i32, i32, i32
  }
  func.func @transform_1(%arg0: i32) -> (i32, i32) {
    %c0_i32 = arith.constant 0 : i32
    %c0_i32_0 = arith.constant 0 : i32
    %c0_i32_1 = arith.constant 0 : i32
    return %c0_i32, %c0_i32_0 : i32, i32
  }
  func.func @transform_2(%arg0: i32) -> (i32, i32) {
    %c0_i32 = arith.constant 0 : i32
    %c0_i32_0 = arith.constant 0 : i32
    %c0_i32_1 = arith.constant 0 : i32
    return %c0_i32, %c0_i32_0 : i32, i32
  }
  func.func @transform_3(%arg0: i32) -> (i32, i32) {
    %c0_i32 = arith.constant 0 : i32
    %c0_i32_0 = arith.constant 0 : i32
    return %arg0, %c0_i32 : i32, i32
  }
}

</mosaic_0001>

<bundles_post_ra>
// kernel: cnn_forward.3
= control target key start
LH: loop header
LB: loop body
LE: loop exit
PB: predicated region body
PF: predicated region fallthrough
CT: control target
= control target key end

     0   :  { %vm247_vm0 = vcmask 1043456   ;;  %vm248_vm1 = vcmask 1044480   ;;  %vm180_vm2 = vcmask 72704   ;;  %v2894_v1 = vmov 65535   ;;  %s4010_s1 = inlined_call_operand.vmem [shape: bf16[9,16], index: 1, kind: input, shape index: {}]   ;;  %s4011_s0 = inlined_call_operand.vmem [shape: bf16[4,338,9], index: 0, kind: input, shape index: {}]   ;;  %s4012_s2 = inlined_call_operand.vmem [shape: f32[1,16], index: 2, kind: input, shape index: {}]   ;;  %s4013_s3 = inlined_call_operand.vmem [shape: bf16[338,16], index: 3, kind: output, shape index: {}]  }
   0x1   :  { %v2804_v0 = vld [vmem:[%s4010_s1] sm:$0x1f]   ;;  %v249_v2 = vsel %vm247_vm0, 4294967295, %v2894_v1  ;;  %v2806_v5 = vld [vmem:[%s4011_s0 + $0xac] sm:$0xff]   ;;  %v2808_v8 = vld [vmem:[%s4011_s0 + $0xb4] sm:$0xff]   ;;  %vm2085_vm3 = vcmask 125952  }
   0x2   :  { %v2805_v3 = vld [vmem:[%s4011_s0] sm:$0xff]   ;;  %v250_v4 = vsel %vm248_vm1, %v249_v2, 0  ;;  %2667 = vmatprep.mubr.msk.bf16.mxu1 %vm180_vm2, %v2806_v5  ;;  %v2807_v7 = vld [vmem:[%s4011_s0 + $0x8] sm:$0xff]   ;;  %v2809_v9 = vld [vmem:[%s4011_s0 + $0x10] sm:$0xff]   ;;  %vm2128_vm4 = vcmask 122880  }
   0x3   :  { %v252_v6 = vand.u32 %v2804_v0, %v250_v4  ;;  %2621 = vmatprep.mubr.msk.bf16.mxu0 %vm180_vm2, %v2805_v3  ;;  %v2810_v10 = vld [vmem:[%s4011_s0 + $0xbc] sm:$0xff]   ;;  %v2812_v12 = vld [vmem:[%s4011_s0 + $0xc4] sm:$0xff]   ;;  %v2814_v14 = vld [vmem:[%s4011_s0 + $0xcc] sm:$0xff]  }
   0x4   :  { %v2811_v11 = vld [vmem:[%s4011_s0 + $0x18] sm:$0xff]   ;;  %v2813_v13 = vld [vmem:[%s4011_s0 + $0x20] sm:$0xff]   ;;  %v2815_v15 = vld [vmem:[%s4011_s0 + $0x28] sm:$0xff]  }
   0x5   :  { %2619 = vmatprep.subr.bf16.mxu0 %v252_v6  ;;  %2665 = vmatprep.subr.bf16.mxu1 %v252_v6  ;;  %v2816_v16 = vld [vmem:[%s4011_s0 + $0xd4] sm:$0xff]   ;;  %v2818_v18 = vld [vmem:[%s4011_s0 + $0xdc] sm:$0xff]   ;;  %v2820_v20 = vld [vmem:[%s4011_s0 + $0xe4] sm:$0xff]  }
   0x6   :  { %2620 = vmatpush3.bf16.msra.mxu0 %v252_v6  ;;  %2666 = vmatpush3.bf16.msra.mxu1 %v252_v6  ;;  %v2817_v17 = vld [vmem:[%s4011_s0 + $0x30] sm:$0xff]   ;;  %v2819_v19 = vld [vmem:[%s4011_s0 + $0x38] sm:$0xff]   ;;  %v2821_v21 = vld [vmem:[%s4011_s0 + $0x40] sm:$0xff]  }
   0x7   :  { %2711 = vmatprep.subr.bf16.mxu0 %v252_v6  ;;  %2757 = vmatprep.subr.bf16.mxu1 %v252_v6  ;;  %v2822_v22 = vld [vmem:[%s4011_s0 + $0xec] sm:$0xff]   ;;  %v2824_v24 = vld [vmem:[%s4011_s0 + $0xf4] sm:$0xff]   ;;  %v2826_v26 = vld [vmem:[%s4011_s0 + $0xfc] sm:$0xff]  }
   0x8   :  { %v2823_v23 = vld [vmem:[%s4011_s0 + $0x48] sm:$0xff]   ;;  %v2825_v25 = vld [vmem:[%s4011_s0 + $0x50] sm:$0xff]   ;;  %v2827_v27 = vld [vmem:[%s4011_s0 + $0x58] sm:$0xff]  }
   0x9   :  { %2622 = vmatmul.mubr.msk.bf16.vlgmr.msra.gmra.mrb[0].mxu0 %vm180_vm2, %v2807_v7  ;;  %2668 = vmatmul.mubr.msk.bf16.vlgmr.msra.gmra.mrb[0].mxu1 %vm180_vm2, %v2808_v8  ;;  %v2828_v28 = vld [vmem:[%s4011_s0 + $0x104] sm:$0xff]   ;;  %v2830_v30 = vld [vmem:[%s4011_s0 + $0x10c] sm:$0xff]   ;;  %v2832_v32 = vld [vmem:[%s4011_s0 + $0x114] sm:$0xff]  }
   0xa   :  { %2712 = vmatpush3.bf16.msra.mxu0 %v252_v6  ;;  %2758 = vmatpush3.bf16.msra.mxu1 %v252_v6  ;;  %v2829_v29 = vld [vmem:[%s4011_s0 + $0x60] sm:$0xff]   ;;  %v2831_v31 = vld [vmem:[%s4011_s0 + $0x68] sm:$0xff]   ;;  %v2833_v33 = vld [vmem:[%s4011_s0 + $0x70] sm:$0xff]  }
   0xb   :  { %2625 = vmatprep.mubr.msk.bf16.mxu0 %vm180_vm2, %v2809_v9  ;;  %2671 = vmatprep.mubr.msk.bf16.mxu1 %vm180_vm2, %v2810_v10  ;;  %v2834_v34 = vld [vmem:[%s4011_s0 + $0x11c] sm:$0xff]   ;;  %v2836_v36 = vld [vmem:[%s4011_s0 + $0x124] sm:$0xff]   ;;  %v2838_v38 = vld [vmem:[%s4011_s0 + $0x12c] sm:$0xff]  }
   0xc   :  { %v2835_v35 = vld [vmem:[%s4011_s0 + $0x78] sm:$0xff]   ;;  %v2837_v37 = vld [vmem:[%s4011_s0 + $0x80] sm:$0xff]   ;;  %v2839_v39 = vld [vmem:[%s4011_s0 + $0x88] sm:$0xff]  }
   0xd   :  { %v2840_v40 = vld [vmem:[%s4011_s0 + $0x134] sm:$0xff]   ;;  %v2842_v42 = vld [vmem:[%s4011_s0 + $0x13c] sm:$0xff]   ;;  %v2844_v44 = vld [vmem:[%s4011_s0 + $0x144] sm:$0xff]  }
   0xe   :  { %v2841_v41 = vld [vmem:[%s4011_s0 + $0x90] sm:$0xff]   ;;  %v2843_v43 = vld [vmem:[%s4011_s0 + $0x98] sm:$0xff]   ;;  %v2845_v45 = vld [vmem:[%s4011_s0 + $0xa0] sm:$0xff]  }
   0xf   :  { %v2846_v46 = vld [vmem:[%s4011_s0 + $0x14c] sm:$0xff]   ;;  %v2847_v47 = vld [vmem:[%s4011_s0 + $0xa8] ss:$0 sps:$4 sm:$0x11]   ;;  %v2849_v49 = vld [vmem:[%s4011_s0 + $0x158] sm:$0xff]  }
  0x10   :  { %v2848_v48 = vld [vmem:[%s4011_s0 + $0x154] ss:$0 sps:$4 sm:$0x11]   ;;  %v2850_v50 = vld [vmem:[%s4011_s0 + $0x204] sm:$0xff]   ;;  %v2852_v52 = vld [vmem:[%s4011_s0 + $0x20c] sm:$0xff]  }
  0x11   :  { %2626 = vmatmul.mubr.msk.bf16.gmra.mrb[4].mxu0 %vm180_vm2, %v2811_v11  ;;  %2672 = vmatmul.mubr.msk.bf16.gmra.mrb[4].mxu1 %vm180_vm2, %v2812_v12  ;;  %v2851_v51 = vld [vmem:[%s4011_s0 + $0x160] sm:$0xff]   ;;  %v2853_v53 = vld [vmem:[%s4011_s0 + $0x168] sm:$0xff]   ;;  %v2854_v54 = vld [vmem:[%s4011_s0 + $0x214] sm:$0xff]  }
  0x12   :  { %2629 = vmatprep.mubr.msk.bf16.mxu0 %vm180_vm2, %v2813_v13  ;;  %2675 = vmatprep.mubr.msk.bf16.mxu1 %vm180_vm2, %v2814_v14  ;;  %v2855_v55 = vld [vmem:[%s4011_s0 + $0x170] sm:$0xff]   ;;  %v2856_v56 = vld [vmem:[%s4011_s0 + $0x21c] sm:$0xff]   ;;  %v2858_v58 = vld [vmem:[%s4011_s0 + $0x224] sm:$0xff]  }
  0x13   :  { %v2857_v57 = vld [vmem:[%s4011_s0 + $0x178] sm:$0xff]   ;;  %v2859_v59 = vld [vmem:[%s4011_s0 + $0x180] sm:$0xff]   ;;  %v2860_v60 = vld [vmem:[%s4011_s0 + $0x22c] sm:$0xff]  }
  0x14   :  { %v2861_v61 = vld [vmem:[%s4011_s0 + $0x188] sm:$0xff]   ;;  %v2862_v62 = vld [vmem:[%s4011_s0 + $0x234] sm:$0xff]   ;;  %v2864_v0 = vld [vmem:[%s4011_s0 + $0x23c] sm:$0xff]  }
  0x15   :  { %v2863_v63 = vld [vmem:[%s4011_s0 + $0x190] sm:$0xff]   ;;  %v2865_v1 = vld [vmem:[%s4011_s0 + $0x198] sm:$0xff]   ;;  %v2866_v2 = vld [vmem:[%s4011_s0 + $0x244] sm:$0xff]  }
  0x16   :  { %v2867_v3 = vld [vmem:[%s4011_s0 + $0x1a0] sm:$0xff]   ;;  %v2868_v4 = vld [vmem:[%s4011_s0 + $0x24c] sm:$0xff]   ;;  %v2870_v6 = vld [vmem:[%s4011_s0 + $0x254] sm:$0xff]  }
  0x17   :  { %v2869_v5 = vld [vmem:[%s4011_s0 + $0x1a8] sm:$0xff]   ;;  %v2871_v7 = vld [vmem:[%s4011_s0 + $0x1b0] sm:$0xff]   ;;  %v2872_v8 = vld [vmem:[%s4011_s0 + $0x25c] sm:$0xff]  }
  0x18   :  { %v2873_v9 = vld [vmem:[%s4011_s0 + $0x1b8] sm:$0xff]   ;;  %v2874_v10 = vld [vmem:[%s4011_s0 + $0x264] sm:$0xff]   ;;  %v2876_v12 = vld [vmem:[%s4011_s0 + $0x26c] sm:$0xff]  }
  0x19   :  { %2630 = vmatmul.mubr.msk.bf16.gmra.mrb[8].mxu0 %vm180_vm2, %v2815_v15  ;;  %2676 = vmatmul.mubr.msk.bf16.gmra.mrb[8].mxu1 %vm180_vm2, %v2816_v16  ;;  %v2875_v11 = vld [vmem:[%s4011_s0 + $0x1c0] sm:$0xff]   ;;  %v2877_v13 = vld [vmem:[%s4011_s0 + $0x1c8] sm:$0xff]   ;;  %v2878_v14 = vld [vmem:[%s4011_s0 + $0x274] sm:$0xff]  }
  0x1a   :  { %2633 = vmatprep.mubr.msk.bf16.mxu0 %vm180_vm2, %v2817_v17  ;;  %2679 = vmatprep.mubr.msk.bf16.mxu1 %vm180_vm2, %v2818_v18  ;;  %v2879_v15 = vld [vmem:[%s4011_s0 + $0x1d0] sm:$0xff]   ;;  %v2880_v16 = vld [vmem:[%s4011_s0 + $0x27c] sm:$0xff]   ;;  %v2882_v18 = vld [vmem:[%s4011_s0 + $0x284] sm:$0xff]  }
  0x1b   :  { %v2881_v17 = vld [vmem:[%s4011_s0 + $0x1d8] sm:$0xff]  }
  0x21   :  { %2634 = vmatmul.mubr.msk.bf16.gmra.mrb[12].mxu0 %vm180_vm2, %v2819_v19  ;;  %2680 = vmatmul.mubr.msk.bf16.gmra.mrb[12].mxu1 %vm180_vm2, %v2820_v20  ;;  %v2883_v19 = vld [vmem:[%s4011_s0 + $0x1e0] sm:$0xff]   ;;  %v2884_v20 = vld [vmem:[%s4011_s0 + $0x28c] sm:$0xff]  }
  0x22   :  { %2637 = vmatprep.mubr.msk.bf16.mxu0 %vm180_vm2, %v2821_v21  ;;  %2683 = vmatprep.mubr.msk.bf16.mxu1 %vm180_vm2, %v2822_v22  ;;  %v2885_v21 = vld [vmem:[%s4011_s0 + $0x1e8] sm:$0xff]   ;;  %v2886_v22 = vld [vmem:[%s4011_s0 + $0x294] sm:$0xff]  }
  0x29   :  { %2638 = vmatmul.mubr.msk.bf16.gmra.mrb[16].mxu0 %vm180_vm2, %v2823_v23  ;;  %2684 = vmatmul.mubr.msk.bf16.gmra.mrb[16].mxu1 %vm180_vm2, %v2824_v24  ;;  %v2887_v23 = vld [vmem:[%s4011_s0 + $0x1f0] sm:$0xff]   ;;  %v2888_v24 = vld [vmem:[%s4011_s0 + $0x29c] sm:$0xff]  }
  0x2a   :  { %2641 = vmatprep.mubr.msk.bf16.mxu0 %vm180_vm2, %v2825_v25  ;;  %2687 = vmatprep.mubr.msk.bf16.mxu1 %vm180_vm2, %v2826_v26  ;;  %v2889_v25 = vld [vmem:[%s4011_s0 + $0x1f8] sm:$0xff]   ;;  %v2890_v26 = vld [vmem:[%s4011_s0 + $0x2a4] sm:$0xff]  }
  0x31   :  { %2642 = vmatmul.mubr.msk.bf16.gmra.mrb[20].mxu0 %vm180_vm2, %v2827_v27  ;;  %2688 = vmatmul.mubr.msk.bf16.gmra.mrb[20].mxu1 %vm180_vm2, %v2828_v28  ;;  %v2891_v27 = vld [vmem:[%s4011_s0 + $0x200] ss:$0 sps:$4 sm:$0x11]   ;;  %v2892_v28 = vld [vmem:[%s4011_s0 + $0x2ac] ss:$0 sps:$4 sm:$0x11]  }
  0x32   :  { %2645 = vmatprep.mubr.msk.bf16.mxu0 %vm180_vm2, %v2829_v29  ;;  %2691 = vmatprep.mubr.msk.bf16.mxu1 %vm180_vm2, %v2830_v30  ;;  %v3273_v29 = vld [vmem:[%s4012_s2] ss:$0 sm:$0xff] }
  0x39   :  { %2646 = vmatmul.mubr.msk.bf16.gmra.mrb[24].mxu0 %vm180_vm2, %v2831_v31  ;;  %2692 = vmatmul.mubr.msk.bf16.gmra.mrb[24].mxu1 %vm180_vm2, %v2832_v32 }
  0x3a   :  { %2649 = vmatprep.mubr.msk.bf16.mxu0 %vm180_vm2, %v2833_v33  ;;  %2695 = vmatprep.mubr.msk.bf16.mxu1 %vm180_vm2, %v2834_v34 }
  0x41   :  { %2650 = vmatmul.mubr.msk.bf16.gmra.mrb[28].mxu0 %vm180_vm2, %v2835_v35  ;;  %2696 = vmatmul.mubr.msk.bf16.gmra.mrb[28].mxu1 %vm180_vm2, %v2836_v36 }
  0x42   :  { %2653 = vmatprep.mubr.msk.bf16.mxu0 %vm180_vm2, %v2837_v37  ;;  %2699 = vmatprep.mubr.msk.bf16.mxu1 %vm180_vm2, %v2838_v38 }
  0x49   :  { %2654 = vmatmul.mubr.msk.bf16.gmra.mrb[32].mxu0 %vm180_vm2, %v2839_v39  ;;  %2700 = vmatmul.mubr.msk.bf16.gmra.mrb[32].mxu1 %vm180_vm2, %v2840_v40 }
  0x4a   :  { %2657 = vmatprep.mubr.msk.bf16.mxu0 %vm180_vm2, %v2841_v41  ;;  %2703 = vmatprep.mubr.msk.bf16.mxu1 %vm180_vm2, %v2842_v42 }
  0x51   :  { %2658 = vmatmul.mubr.msk.bf16.gmra.mrb[36].mxu0 %vm180_vm2, %v2843_v43  ;;  %2704 = vmatmul.mubr.msk.bf16.gmra.mrb[36].mxu1 %vm180_vm2, %v2844_v44 }
  0x52   :  { %2661 = vmatprep.mubr.msk.bf16.mxu0 %vm180_vm2, %v2845_v45  ;;  %2707 = vmatprep.mubr.msk.bf16.mxu1 %vm180_vm2, %v2846_v46 }
  0x59   :  { %2662 = vmatmul.mubr.msk.bf16.gmra.mrb[40].mxu0 %vm180_vm2, %v2847_v47  ;;  %2708 = vmatmul.mubr.msk.bf16.gmra.mrb[40].mxu1 %vm180_vm2, %v2848_v48 }
  0x5a   :  { %2713 = vmatprep.mubr.msk.bf16.mxu0 %vm180_vm2, %v2849_v49  ;;  %2759 = vmatprep.mubr.msk.bf16.mxu1 %vm180_vm2, %v2850_v50 }
  0x61   :  { %2714 = vmatmul.mubr.msk.bf16.vlgmr.msra.gmra.mrb[44].mxu0 %vm180_vm2, %v2851_v51  ;;  %2760 = vmatmul.mubr.msk.bf16.vlgmr.msra.gmra.mrb[44].mxu1 %vm180_vm2, %v2852_v52 }
  0x62   :  { %2717 = vmatprep.mubr.msk.bf16.mxu0 %vm180_vm2, %v2853_v53  ;;  %2763 = vmatprep.mubr.msk.bf16.mxu1 %vm180_vm2, %v2854_v54 }
  0x69   :  { %2718 = vmatmul.mubr.msk.bf16.gmra.mrb[48].mxu0 %vm180_vm2, %v2855_v55  ;;  %2764 = vmatmul.mubr.msk.bf16.gmra.mrb[48].mxu1 %vm180_vm2, %v2856_v56 }
  0x6a   :  { %2721 = vmatprep.mubr.msk.bf16.mxu0 %vm180_vm2, %v2857_v57  ;;  %2767 = vmatprep.mubr.msk.bf16.mxu1 %vm180_vm2, %v2858_v58 }
  0x71   :  { %2722 = vmatmul.mubr.msk.bf16.gmra.mrb[52].mxu0 %vm180_vm2, %v2859_v59  ;;  %2768 = vmatmul.mubr.msk.bf16.gmra.mrb[52].mxu1 %vm180_vm2, %v2860_v60 }
  0x72   :  { %2725 = vmatprep.mubr.msk.bf16.mxu0 %vm180_vm2, %v2861_v61  ;;  %2771 = vmatprep.mubr.msk.bf16.mxu1 %vm180_vm2, %v2862_v62 }
  0x79   :  { %2726 = vmatmul.mubr.msk.bf16.gmra.mrb[56].mxu0 %vm180_vm2, %v2863_v63  ;;  %2772 = vmatmul.mubr.msk.bf16.gmra.mrb[56].mxu1 %vm180_vm2, %v2864_v0 }
  0x7a   :  { %2729 = vmatprep.mubr.msk.bf16.mxu0 %vm180_vm2, %v2865_v1  ;;  %2775 = vmatprep.mubr.msk.bf16.mxu1 %vm180_vm2, %v2866_v2 }
  0x81   :  { %2730 = vmatmul.mubr.msk.bf16.gmra.mrb[60].mxu0 %vm180_vm2, %v2867_v3  ;;  %2776 = vmatmul.mubr.msk.bf16.gmra.mrb[60].mxu1 %vm180_vm2, %v2868_v4 }
  0x82   :  { %2733 = vmatprep.mubr.msk.bf16.mxu0 %vm180_vm2, %v2869_v5  ;;  %2779 = vmatprep.mubr.msk.bf16.mxu1 %vm180_vm2, %v2870_v6 }
  0x89   :  { %2734 = vmatmul.mubr.msk.bf16.gmra.mrb[64].mxu0 %vm180_vm2, %v2871_v7  ;;  %2780 = vmatmul.mubr.msk.bf16.gmra.mrb[64].mxu1 %vm180_vm2, %v2872_v8 }
  0x8a   :  { %2737 = vmatprep.mubr.msk.bf16.mxu0 %vm180_vm2, %v2873_v9  ;;  %2783 = vmatprep.mubr.msk.bf16.mxu1 %vm180_vm2, %v2874_v10 }
  0x91   :  { %2738 = vmatmul.mubr.msk.bf16.gmra.mrb[68].mxu0 %vm180_vm2, %v2875_v11  ;;  %2784 = vmatmul.mubr.msk.bf16.gmra.mrb[68].mxu1 %vm180_vm2, %v2876_v12 }
  0x92   :  { %2741 = vmatprep.mubr.msk.bf16.mxu0 %vm180_vm2, %v2877_v13  ;;  %2787 = vmatprep.mubr.msk.bf16.mxu1 %vm180_vm2, %v2878_v14 }
  0x99   :  { %2742 = vmatmul.mubr.msk.bf16.gmra.mrb[72].mxu0 %vm180_vm2, %v2879_v15  ;;  %2788 = vmatmul.mubr.msk.bf16.gmra.mrb[72].mxu1 %vm180_vm2, %v2880_v16 }
  0x9a   :  { %2745 = vmatprep.mubr.msk.bf16.mxu0 %vm180_vm2, %v2881_v17  ;;  %2791 = vmatprep.mubr.msk.bf16.mxu1 %vm180_vm2, %v2882_v18 }
  0xa1   :  { %2746 = vmatmul.mubr.msk.bf16.gmra.mrb[76].mxu0 %vm180_vm2, %v2883_v19  ;;  %2792 = vmatmul.mubr.msk.bf16.gmra.mrb[76].mxu1 %vm180_vm2, %v2884_v20 }
  0xa2   :  { %2749 = vmatprep.mubr.msk.bf16.mxu0 %vm180_vm2, %v2885_v21  ;;  %2795 = vmatprep.mubr.msk.bf16.mxu1 %vm180_vm2, %v2886_v22 }
  0xa9   :  { %2750 = vmatmul.mubr.msk.bf16.gmra.mrb[80].mxu0 %vm180_vm2, %v2887_v23  ;;  %2796 = vmatmul.mubr.msk.bf16.gmra.mrb[80].mxu1 %vm180_vm2, %v2888_v24 }
  0xaa   :  { %2753 = vmatprep.mubr.msk.bf16.mxu0 %vm180_vm2, %v2889_v25  ;;  %2799 = vmatprep.mubr.msk.bf16.mxu1 %vm180_vm2, %v2890_v26 }
  0xb1   :  { %2754 = vmatmul.mubr.msk.bf16.gmra.mrb[84].mxu0 %vm180_vm2, %v2891_v27  ;;  %2800 = vmatmul.mubr.msk.bf16.gmra.mrb[84].mxu1 %vm180_vm2, %v2892_v28 }
  0xdc   :  { %v2623_v30 = vpop.f32.mrb[0].mxu0  ;;  %v2669_v31 = vpop.f32.mrb[0].mxu1 }
  0xdd   :  { %v3276_v32 = vadd.f32 %v2623_v30, %v3273_v29  ;;  %v3279_v33 = vadd.f32 %v2669_v31, %v3273_v29  ;;  %v288_v34 = vpop.f32.mrb[1].mxu0  ;;  %v714_v35 = vpop.f32.mrb[1].mxu1 }
  0xde   :  { %v3282_v36 = vadd.f32 %v3273_v29, %v288_v34  ;;  %v3285_v37 = vadd.f32 %v3273_v29, %v714_v35  ;;  %v2624_v38 = vpop.f32.mrb[2].mxu0  ;;  %v2670_v39 = vpop.f32.mrb[2].mxu1 }
  0xdf   :  { %v3290_v41 = vadd.f32 %v2624_v38, %v3273_v29  ;;  %v3293_v42 = vadd.f32 %v2670_v39, %v3273_v29  ;;  %v291_v43 = vpop.f32.mrb[3].mxu0  ;;  %v717_v44 = vpop.f32.mrb[3].mxu1 }
  0xe0   :  { %v3298_v46 = vadd.f32 %v3273_v29, %v291_v43  ;;  %v3301_v47 = vadd.f32 %v3273_v29, %v717_v44 }
  0xe4   :  { %v2627_v50 = vpop.f32.mrb[4].mxu0  ;;  %v2673_v51 = vpop.f32.mrb[4].mxu1 }
  0xe5   :  { %v3308_v52 = vadd.f32 %v2627_v50, %v3273_v29  ;;  %v3311_v53 = vadd.f32 %v2673_v51, %v3273_v29  ;;  %v304_v54 = vpop.f32.mrb[5].mxu0  ;;  %v730_v55 = vpop.f32.mrb[5].mxu1 }
  0xe6   :  { %v3314_v56 = vadd.f32 %v3273_v29, %v304_v54  ;;  %v3317_v57 = vadd.f32 %v3273_v29, %v730_v55  ;;  %v2628_v58 = vpop.f32.mrb[6].mxu0  ;;  %v2674_v59 = vpop.f32.mrb[6].mxu1 }
  0xe7   :  { %v3322_v61 = vadd.f32 %v2628_v58, %v3273_v29  ;;  %v3325_v62 = vadd.f32 %v2674_v59, %v3273_v29  ;;  %v307_v63 = vpop.f32.mrb[7].mxu0  ;;  %v733_v0 = vpop.f32.mrb[7].mxu1 }
  0xe8   :  { %v3330_v2 = vadd.f32 %v3273_v29, %v307_v63  ;;  %v3333_v3 = vadd.f32 %v3273_v29, %v733_v0 }
  0xec   :  { %v2631_v6 = vpop.f32.mrb[8].mxu0  ;;  %v2677_v7 = vpop.f32.mrb[8].mxu1 }
  0xed   :  { %v3340_v8 = vadd.f32 %v2631_v6, %v3273_v29  ;;  %v3343_v9 = vadd.f32 %v2677_v7, %v3273_v29  ;;  %v320_v10 = vpop.f32.mrb[9].mxu0  ;;  %v746_v11 = vpop.f32.mrb[9].mxu1 }
  0xee   :  { %v3346_v12 = vadd.f32 %v3273_v29, %v320_v10  ;;  %v3349_v13 = vadd.f32 %v3273_v29, %v746_v11  ;;  %v2632_v14 = vpop.f32.mrb[10].mxu0  ;;  %v2678_v15 = vpop.f32.mrb[10].mxu1 }
  0xef   :  { %v3354_v17 = vadd.f32 %v2632_v14, %v3273_v29  ;;  %v3357_v18 = vadd.f32 %v2678_v15, %v3273_v29  ;;  %v323_v19 = vpop.f32.mrb[11].mxu0  ;;  %v749_v20 = vpop.f32.mrb[11].mxu1 }
  0xf0   :  { %v3362_v22 = vadd.f32 %v3273_v29, %v323_v19  ;;  %v3365_v23 = vadd.f32 %v3273_v29, %v749_v20 }
  0xf4   :  { %v2635_v26 = vpop.f32.mrb[12].mxu0  ;;  %v2681_v27 = vpop.f32.mrb[12].mxu1 }
  0xf5   :  { %v3372_v28 = vadd.f32 %v2635_v26, %v3273_v29  ;;  %v3375_v30 = vadd.f32 %v2681_v27, %v3273_v29  ;;  %v336_v31 = vpop.f32.mrb[13].mxu0  ;;  %v762_v34 = vpop.f32.mrb[13].mxu1 }
  0xf6   :  { %v3378_v35 = vadd.f32 %v3273_v29, %v336_v31  ;;  %v3381_v38 = vadd.f32 %v3273_v29, %v762_v34  ;;  %v2636_v39 = vpop.f32.mrb[14].mxu0  ;;  %v2682_v43 = vpop.f32.mrb[14].mxu1 }
  0xf7   :  { %v3386_v50 = vadd.f32 %v2636_v39, %v3273_v29  ;;  %v3389_v51 = vadd.f32 %v2682_v43, %v3273_v29  ;;  %v339_v54 = vpop.f32.mrb[15].mxu0  ;;  %v765_v55 = vpop.f32.mrb[15].mxu1 }
  0xf8   :  { %v3394_v59 = vadd.f32 %v3273_v29, %v339_v54  ;;  %v3397_v63 = vadd.f32 %v3273_v29, %v765_v55 }
  0xfc   :  { %v2639_v7 = vpop.f32.mrb[16].mxu0  ;;  %v2685_v10 = vpop.f32.mrb[16].mxu1 }
  0xfd   :  { %v3404_v11 = vadd.f32 %v2639_v7, %v3273_v29  ;;  %v3407_v14 = vadd.f32 %v2685_v10, %v3273_v29  ;;  %v352_v15 = vpop.f32.mrb[17].mxu0  ;;  %v778_v19 = vpop.f32.mrb[17].mxu1 }
  0xfe   :  { %v3410_v20 = vadd.f32 %v3273_v29, %v352_v15  ;;  %v3413_v26 = vadd.f32 %v3273_v29, %v778_v19  ;;  %v2640_v27 = vpop.f32.mrb[18].mxu0  ;;  %v2686_v31 = vpop.f32.mrb[18].mxu1 }
  0xff   :  { %v3418_v39 = vadd.f32 %v2640_v27, %v3273_v29  ;;  %v3421_v43 = vadd.f32 %v2686_v31, %v3273_v29  ;;  %v355_v54 = vpop.f32.mrb[19].mxu0  ;;  %v781_v55 = vpop.f32.mrb[19].mxu1 }
 0x100   :  { %v3426_v10 = vadd.f32 %v3273_v29, %v355_v54  ;;  %v3429_v15 = vadd.f32 %v3273_v29, %v781_v55 }
 0x104   :  { %v2643_v34 = vpop.f32.mrb[20].mxu0  ;;  %v2689_v31 = vpop.f32.mrb[20].mxu1 }
 0x105   :  { %v3436_v6 = vadd.f32 %v2643_v34, %v3273_v29  ;;  %v3439_v0 = vadd.f32 %v2689_v31, %v3273_v29  ;;  %v368_v7 = vpop.f32.mrb[21].mxu0  ;;  %v794_v54 = vpop.f32.mrb[21].mxu1 }
 0x106   :  { %v3442_v58 = vadd.f32 %v3273_v29, %v368_v7  ;;  %v3445_v55 = vadd.f32 %v3273_v29, %v794_v54  ;;  %v2644_v19 = vpop.f32.mrb[22].mxu0  ;;  %v2690_v44 = vpop.f32.mrb[22].mxu1 }
 0x107   :  { %v3450_v25 = vadd.f32 %v2644_v19, %v3273_v29  ;;  %v3453_v34 = vadd.f32 %v2690_v44, %v3273_v29  ;;  %v371_v31 = vpop.f32.mrb[23].mxu0  ;;  %v797_v24 = vpop.f32.mrb[23].mxu1 }
 0x108   :  { %v3458_v21 = vadd.f32 %v3273_v29, %v371_v31  ;;  %v3461_v54 = vadd.f32 %v3273_v29, %v797_v24 }
 0x109   :  { %4056 = vst [vmem:[#allocation2_spill] sm:$0xff] %v3450_v25  ;;  %4057 = vst [vmem:[#allocation3_spill] sm:$0xff] %v3453_v34 }
 0x10a   :  { %4058 = vst [vmem:[#allocation4_spill] sm:$0xff] %v3458_v21  ;;  %4059 = vst [vmem:[#allocation5_spill] sm:$0xff] %v3461_v54 }
 0x10c   :  { %v2647_v16 = vpop.f32.mrb[24].mxu0  ;;  %v2693_v44 = vpop.f32.mrb[24].mxu1 }
 0x10d   :  { %v3468_v5 = vadd.f32 %v2647_v16, %v3273_v29  ;;  %v3471_v4 = vadd.f32 %v2693_v44, %v3273_v29  ;;  %v384_v7 = vpop.f32.mrb[25].mxu0  ;;  %v810_v31 = vpop.f32.mrb[25].mxu1 }
 0x10e   :  { %v3474_v1 = vadd.f32 %v3273_v29, %v384_v7  ;;  %v3477_v24 = vadd.f32 %v3273_v29, %v810_v31  ;;  %v2648_v27 = vpop.f32.mrb[26].mxu0  ;;  %v2694_v60 = vpop.f32.mrb[26].mxu1 }
 0x10f   :  { %4060 = vst [vmem:[#allocation6_spill] sm:$0xff] %v3468_v5  ;;  %4061 = vst [vmem:[#allocation7_spill] sm:$0xff] %v3471_v4  ;;  %v3482_v49 = vadd.f32 %v2648_v27, %v3273_v29  ;;  %v3485_v16 = vadd.f32 %v2694_v60, %v3273_v29  ;;  %v387_v44 = vpop.f32.mrb[27].mxu0  ;;  %v813_v48 = vpop.f32.mrb[27].mxu1 }
 0x110   :  { %4062 = vst [vmem:[#allocation8_spill] sm:$0xff] %v3474_v1  ;;  %4063 = vst [vmem:[#allocation9_spill] sm:$0xff] %v3477_v24  ;;  %v3490_v45 = vadd.f32 %v3273_v29, %v387_v44  ;;  %v3493_v31 = vadd.f32 %v3273_v29, %v813_v48 }
 0x111   :  { %4064 = vst [vmem:[#allocation10_spill] sm:$0xff] %v3482_v49  ;;  %4065 = vst [vmem:[#allocation11_spill] sm:$0xff] %v3485_v16 }
 0x112   :  { %4066 = vst [vmem:[#allocation12_spill] sm:$0xff] %v3490_v45  ;;  %4067 = vst [vmem:[#allocation13_spill] sm:$0xff] %v3493_v31 }
 0x114   :  { %v2651_v40 = vpop.f32.mrb[28].mxu0  ;;  %v2697_v60 = vpop.f32.mrb[28].mxu1 }
 0x115   :  { %v3500_v4 = vadd.f32 %v2651_v40, %v3273_v29  ;;  %v3503_v5 = vadd.f32 %v2697_v60, %v3273_v29  ;;  %v400_v7 = vpop.f32.mrb[29].mxu0  ;;  %v826_v44 = vpop.f32.mrb[29].mxu1 }
 0x116   :  { %v3506_v24 = vadd.f32 %v3273_v29, %v400_v7  ;;  %v3509_v48 = vadd.f32 %v3273_v29, %v826_v44  ;;  %v2652_v19 = vpop.f32.mrb[30].mxu0  ;;  %v2698_v16 = vpop.f32.mrb[30].mxu1 }
 0x117   :  { %4068 = vst [vmem:[#allocation14_spill] sm:$0xff] %v3500_v4  ;;  %4069 = vst [vmem:[#allocation15_spill] sm:$0xff] %v3503_v5  ;;  %v3514_v31 = vadd.f32 %v2652_v19, %v3273_v29  ;;  %v3517_v40 = vadd.f32 %v2698_v16, %v3273_v29  ;;  %v403_v60 = vpop.f32.mrb[31].mxu0  ;;  %v829_v45 = vpop.f32.mrb[31].mxu1 }
 0x118   :  { %4070 = vst [vmem:[#allocation16_spill] sm:$0xff] %v3506_v24  ;;  %4071 = vst [vmem:[#allocation17_spill] sm:$0xff] %v3509_v48  ;;  %v3522_v49 = vadd.f32 %v3273_v29, %v403_v60  ;;  %v3525_v44 = vadd.f32 %v3273_v29, %v829_v45 }
 0x119   :  { %4072 = vst [vmem:[#allocation18_spill] sm:$0xff] %v3514_v31  ;;  %4073 = vst [vmem:[#allocation19_spill] sm:$0xff] %v3517_v40 }
 0x11a   :  { %4074 = vst [vmem:[#allocation20_spill] sm:$0xff] %v3522_v49  ;;  %4075 = vst [vmem:[#allocation21_spill] sm:$0xff] %v3525_v44 }
 0x11c   :  { %v2655_v5 = vpop.f32.mrb[32].mxu0  ;;  %v2701_v16 = vpop.f32.mrb[32].mxu1 }
 0x11d   :  { %v3532_v4 = vadd.f32 %v2655_v5, %v3273_v29  ;;  %v3535_v1 = vadd.f32 %v2701_v16, %v3273_v29  ;;  %v416_v7 = vpop.f32.mrb[33].mxu0  ;;  %v842_v60 = vpop.f32.mrb[33].mxu1 }
 0x11e   :  { %v3538_v48 = vadd.f32 %v3273_v29, %v416_v7  ;;  %v3541_v45 = vadd.f32 %v3273_v29, %v842_v60  ;;  %v2656_v27 = vpop.f32.mrb[34].mxu0  ;;  %v2702_v40 = vpop.f32.mrb[34].mxu1 }
 0x11f   :  { %4076 = vst [vmem:[#allocation22_spill] sm:$0xff] %v3532_v4  ;;  %4077 = vst [vmem:[#allocation23_spill] sm:$0xff] %v3535_v1  ;;  %v3546_v44 = vadd.f32 %v2656_v27, %v3273_v29  ;;  %v3549_v5 = vadd.f32 %v2702_v40, %v3273_v29  ;;  %v419_v16 = vpop.f32.mrb[35].mxu0  ;;  %v845_v49 = vpop.f32.mrb[35].mxu1 }
 0x120   :  { %4078 = vst [vmem:[#allocation24_spill] sm:$0xff] %v3538_v48  ;;  %4079 = vst [vmem:[#allocation25_spill] sm:$0xff] %v3541_v45  ;;  %v3554_v31 = vadd.f32 %v3273_v29, %v419_v16  ;;  %v3557_v60 = vadd.f32 %v3273_v29, %v845_v49 }
 0x121   :  { %4080 = vst [vmem:[#allocation26_spill] sm:$0xff] %v3546_v44  ;;  %4081 = vst [vmem:[#allocation27_spill] sm:$0xff] %v3549_v5 }
 0x122   :  { %4082 = vst [vmem:[#allocation28_spill] sm:$0xff] %v3554_v31  ;;  %4083 = vst [vmem:[#allocation29_spill] sm:$0xff] %v3557_v60 }
 0x124   :  { %v2659_v1 = vpop.f32.mrb[36].mxu0  ;;  %v2705_v40 = vpop.f32.mrb[36].mxu1 }
 0x125   :  { %v3564_v4 = vadd.f32 %v2659_v1, %v3273_v29  ;;  %v3567_v24 = vadd.f32 %v2705_v40, %v3273_v29  ;;  %v432_v7 = vpop.f32.mrb[37].mxu0  ;;  %v858_v16 = vpop.f32.mrb[37].mxu1 }
 0x126   :  { %v3570_v45 = vadd.f32 %v3273_v29, %v432_v7  ;;  %v3573_v49 = vadd.f32 %v3273_v29, %v858_v16  ;;  %v2660_v19 = vpop.f32.mrb[38].mxu0  ;;  %v2706_v5 = vpop.f32.mrb[38].mxu1 }
 0x127   :  { %4084 = vst [vmem:[#allocation30_spill] sm:$0xff] %v3564_v4  ;;  %4085 = vst [vmem:[#allocation31_spill] sm:$0xff] %v3567_v24  ;;  %v3578_v60 = vadd.f32 %v2660_v19, %v3273_v29  ;;  %v3581_v1 = vadd.f32 %v2706_v5, %v3273_v29  ;;  %v435_v40 = vpop.f32.mrb[39].mxu0  ;;  %v861_v31 = vpop.f32.mrb[39].mxu1 }
 0x128   :  { %4086 = vst [vmem:[#allocation32_spill] sm:$0xff] %v3570_v45  ;;  %4087 = vst [vmem:[#allocation33_spill] sm:$0xff] %v3573_v49  ;;  %v3586_v44 = vadd.f32 %v3273_v29, %v435_v40  ;;  %v3589_v16 = vadd.f32 %v3273_v29, %v861_v31 }
 0x129   :  { %4088 = vst [vmem:[#allocation34_spill] sm:$0xff] %v3578_v60  ;;  %4089 = vst [vmem:[#allocation35_spill] sm:$0xff] %v3581_v1 }
 0x12a   :  { %4090 = vst [vmem:[#allocation36_spill] sm:$0xff] %v3586_v44  ;;  %4091 = vst [vmem:[#allocation37_spill] sm:$0xff] %v3589_v16 }
 0x12c   :  { %v2663_v24 = vpop.f32.mrb[40].mxu0  ;;  %v2709_v5 = vpop.f32.mrb[40].mxu1 }
 0x12d   :  { %v3596_v4 = vadd.f32 %v2663_v24, %v3273_v29  ;;  %v3599_v48 = vadd.f32 %v2709_v5, %v3273_v29  ;;  %v448_v7 = vpop.f32.mrb[41].mxu0  ;;  %v874_v40 = vpop.f32.mrb[41].mxu1 }
 0x12e   :  { %v3602_v49 = vadd.f32 %v3273_v29, %v448_v7  ;;  %v3605_v31 = vadd.f32 %v3273_v29, %v874_v40  ;;  %v2664_v27 = vpop.f32.mrb[42].mxu0  ;;  %v2710_v1 = vpop.f32.mrb[42].mxu1 }
 0x12f   :  { %4092 = vst [vmem:[#allocation38_spill] sm:$0xff] %v3596_v4  ;;  %4093 = vst [vmem:[#allocation39_spill] sm:$0xff] %v3599_v48  ;;  %v451_v16 = vpop.f32.mrb[43].mxu0  ;;  %v877_v44 = vpop.f32.mrb[43].mxu1 }
 0x130   :  { %4094 = vst [vmem:[#allocation40_spill] sm:$0xff] %v3602_v49  ;;  %4095 = vst [vmem:[#allocation41_spill] sm:$0xff] %v3605_v31  ;;  %v3612_v5 = vadd.f32 %v3273_v29, %v451_v16  ;;  %v3615_v60 = vadd.f32 %v3273_v29, %v877_v44  ;;  %v4098_v44 = vmax.f32 %v3276_v32, %v3279_v33 }
 0x131   :  { %v4101_v32 = vmax.f32 %v3298_v46, %v3301_v47 }
 0x132   :  { %4096 = vst [vmem:[#allocation42_spill] sm:$0xff] %v3612_v5  ;;  %4097 = vst [vmem:[#allocation43_spill] sm:$0xff] %v3615_v60 }
 0x134   :  { %v2715_v40 = vpop.f32.mrb[44].mxu0  ;;  %v2761_v27 = vpop.f32.mrb[44].mxu1 }
 0x135   :  { %v1192_v1 = vadd.f32 %v2715_v40, %v3273_v29  ;;  %v1661_v19 = vadd.f32 %v2761_v27, %v3273_v29  ;;  %v1183_v48 = vpop.f32.mrb[45].mxu0  ;;  %v1652_v4 = vpop.f32.mrb[45].mxu1  ;;  %v4099_v40 = vmax.f32 %v3282_v36, %v3285_v37 }
 0x136   :  { %v1184_v45 = vadd.f32 %v3273_v29, %v1183_v48  ;;  %v1653_v24 = vadd.f32 %v3273_v29, %v1652_v4  ;;  %v2716_v16 = vpop.f32.mrb[46].mxu0  ;;  %v2762_v31 = vpop.f32.mrb[46].mxu1  ;;  %v4100_v4 = vmax.f32 %v3290_v41, %v3293_v42 }
 0x137   :  { %v1359_v49 = vmax.f32 %v4098_v44, %v1192_v1  ;;  %v1195_v7 = vadd.f32 %v2716_v16, %v3273_v29  ;;  %v1186_v60 = vpop.f32.mrb[47].mxu0  ;;  %v1655_v5 = vpop.f32.mrb[47].mxu1  ;;  %v1664_v34 = vadd.f32 %v2762_v31, %v3273_v29 }
 0x138   :  { %v1357_v27 = vmax.f32 %v4099_v40, %v1184_v45  ;;  %v1187_v54 = vadd.f32 %v3273_v29, %v1186_v60  ;;  %v1656_v1 = vadd.f32 %v3273_v29, %v1655_v5  ;;  %v4102_v5 = vmax.f32 %v3308_v52, %v3311_v53 }
 0x139   :  { %v1828_v21 = vmax.f32 %v1359_v49, %v1661_v19  ;;  %v1360_v48 = vmax.f32 %v4100_v4, %v1195_v7  ;;  %v4104_v53 = vmax.f32 %v3322_v61, %v3325_v62 }
 0x13a   :  { %v1826_v25 = vmax.f32 %v1357_v27, %v1653_v24  ;;  %v1358_v33 = vmax.f32 %v4101_v32, %v1187_v54 }
 0x13b   :  { %v1871_v16 = vmax.f32 %v1828_v21, 0.0  ;;  %v1829_v44 = vmax.f32 %v1360_v48, %v1664_v34 }
 0x13c   :  { %v1869_v36 = vmax.f32 %v1826_v25, 0.0  ;;  %v1827_v37 = vmax.f32 %v1358_v33, %v1656_v1  ;;  %v2719_v45 = vpop.f32.mrb[48].mxu0  ;;  %v2765_v60 = vpop.f32.mrb[48].mxu1  ;;  %v4103_v33 = vmax.f32 %v3314_v56, %v3317_v57  ;;  %v4105_v57 = vmax.f32 %v3330_v2, %v3333_v3 }
 0x13d   :  { %v2486_v49 = vpack.c.bf16 %v1871_v16, %v1871_v16  ;;  %v1872_v19 = vmax.f32 %v1829_v44, 0.0  ;;  %v1208_v41 = vadd.f32 %v2719_v45, %v3273_v29  ;;  %v1677_v42 = vadd.f32 %v2765_v60, %v3273_v29  ;;  %v1199_v31 = vpop.f32.mrb[49].mxu0  ;;  %v1668_v24 = vpop.f32.mrb[49].mxu1 }
 0x13e   :  { %v2484_v7 = vpack.c.bf16 %v1869_v36, %v1869_v36  ;;  %v1870_v46 = vmax.f32 %v1827_v37, 0.0  ;;  %v1200_v47 = vadd.f32 %v3273_v29, %v1199_v31  ;;  %v1669_v21 = vadd.f32 %v3273_v29, %v1668_v24  ;;  %v2720_v34 = vpop.f32.mrb[50].mxu0  ;;  %v2766_v54 = vpop.f32.mrb[50].mxu1 }
 0x13f   :  { %2088 = vst.msk [vmem:[%s4013_s3 + $0x8] sm:$0xf] %vm2085_vm3, %v2486_v49  ;;  %v2487_v25 = vpack.c.bf16 %v1872_v19, %v1872_v19  ;;  %v1363_v40 = vmax.f32 %v4102_v5, %v1208_v41  ;;  %v1211_v27 = vadd.f32 %v2720_v34, %v3273_v29  ;;  %v1202_v4 = vpop.f32.mrb[51].mxu0  ;;  %v1671_v48 = vpop.f32.mrb[51].mxu1  ;;  %v1680_v36 = vadd.f32 %v2766_v54, %v3273_v29 }
 0x140   :  { %2086 = vst.msk [vmem:[%s4013_s3] sm:$0xf] %vm2085_vm3, %v2484_v7  ;;  %v2485_v32 = vpack.c.bf16 %v1870_v46, %v1870_v46  ;;  %v1361_v1 = vmax.f32 %v4103_v33, %v1200_v47  ;;  %v1203_v16 = vadd.f32 %v3273_v29, %v1202_v4  ;;  %v1672_v45 = vadd.f32 %v3273_v29, %v1671_v48 }
 0x141   :  { %2089 = vst.msk [vmem:[%s4013_s3 + $0xc] sm:$0xf] %vm2085_vm3, %v2487_v25  ;;  %v1832_v52 = vmax.f32 %v1363_v40, %v1677_v42  ;;  %v1364_v44 = vmax.f32 %v4104_v53, %v1211_v27  ;;  %v4106_v40 = vmax.f32 %v3340_v8, %v3343_v9  ;;  %v4108_v9 = vmax.f32 %v3354_v17, %v3357_v18 }
 0x142   :  { %2087 = vst.msk [vmem:[%s4013_s3 + $0x4] sm:$0xf] %vm2085_vm3, %v2485_v32  ;;  %v1830_v56 = vmax.f32 %v1361_v1, %v1669_v21  ;;  %v1362_v37 = vmax.f32 %v4105_v57, %v1203_v16  ;;  %v4107_v1 = vmax.f32 %v3346_v12, %v3349_v13  ;;  %v4109_v13 = vmax.f32 %v3362_v22, %v3365_v23 }
 0x143   :  { %v1875_v60 = vmax.f32 %v1832_v52, 0.0  ;;  %v1833_v49 = vmax.f32 %v1364_v44, %v1680_v36 }
 0x144   :  { %v1873_v19 = vmax.f32 %v1830_v56, 0.0  ;;  %v1831_v41 = vmax.f32 %v1362_v37, %v1672_v45  ;;  %v2723_v61 = vpop.f32.mrb[52].mxu0  ;;  %v2769_v62 = vpop.f32.mrb[52].mxu1 }
 0x145   :  { %v2490_v42 = vpack.c.bf16 %v1875_v60, %v1875_v60  ;;  %v1876_v31 = vmax.f32 %v1833_v49, 0.0  ;;  %v1224_v24 = vadd.f32 %v2723_v61, %v3273_v29  ;;  %v1693_v7 = vadd.f32 %v2769_v62, %v3273_v29  ;;  %v1215_v46 = vpop.f32.mrb[53].mxu0  ;;  %v1684_v47 = vpop.f32.mrb[53].mxu1 }
 0x146   :  { %v2488_v21 = vpack.c.bf16 %v1873_v19, %v1873_v19  ;;  %v1874_v34 = vmax.f32 %v1831_v41, 0.0  ;;  %v1216_v2 = vadd.f32 %v3273_v29, %v1215_v46  ;;  %v1685_v3 = vadd.f32 %v3273_v29, %v1684_v47  ;;  %v2724_v54 = vpop.f32.mrb[54].mxu0  ;;  %v2770_v25 = vpop.f32.mrb[54].mxu1 }
 0x147   :  { %2092 = vst.msk [vmem:[%s4013_s3 + $0x18] sm:$0xf] %vm2085_vm3, %v2490_v42  ;;  %v2491_v5 = vpack.c.bf16 %v1876_v31, %v1876_v31  ;;  %v1367_v27 = vmax.f32 %v4106_v40, %v1224_v24  ;;  %v1227_v4 = vadd.f32 %v2724_v54, %v3273_v29  ;;  %v1218_v48 = vpop.f32.mrb[55].mxu0  ;;  %v1687_v32 = vpop.f32.mrb[55].mxu1  ;;  %v1696_v44 = vadd.f32 %v2770_v25, %v3273_v29 }
 0x148   :  { %2090 = vst.msk [vmem:[%s4013_s3 + $0x10] sm:$0xf] %vm2085_vm3, %v2488_v21  ;;  %v2489_v33 = vpack.c.bf16 %v1874_v34, %v1874_v34  ;;  %v1365_v16 = vmax.f32 %v4107_v1, %v1216_v2  ;;  %v1219_v52 = vadd.f32 %v3273_v29, %v1218_v48  ;;  %v1688_v56 = vadd.f32 %v3273_v29, %v1687_v32 }
 0x149   :  { %2093 = vst.msk [vmem:[%s4013_s3 + $0x1c] sm:$0xf] %vm2085_vm3, %v2491_v5  ;;  %v1836_v8 = vmax.f32 %v1367_v27, %v1693_v7  ;;  %v1368_v53 = vmax.f32 %v4108_v9, %v1227_v4  ;;  %v4110_v21 = vmax.f32 %v3372_v28, %v3375_v30  ;;  %v4111_v5 = vmax.f32 %v3378_v35, %v3381_v38 }
 0x14a   :  { %2091 = vst.msk [vmem:[%s4013_s3 + $0x14] sm:$0xf] %vm2085_vm3, %v2489_v33  ;;  %v1834_v12 = vmax.f32 %v1365_v16, %v1685_v3  ;;  %v1366_v36 = vmax.f32 %v4109_v13, %v1219_v52  ;;  %v4112_v30 = vmax.f32 %v3386_v50, %v3389_v51  ;;  %v4113_v38 = vmax.f32 %v3394_v59, %v3397_v63 }
 0x14b   :  { %v1879_v57 = vmax.f32 %v1836_v8, 0.0  ;;  %v1837_v37 = vmax.f32 %v1368_v53, %v1696_v44 }
 0x14c   :  { %v1877_v45 = vmax.f32 %v1834_v12, 0.0  ;;  %v1835_v60 = vmax.f32 %v1366_v36, %v1688_v56  ;;  %v2727_v17 = vpop.f32.mrb[56].mxu0  ;;  %v2773_v18 = vpop.f32.mrb[56].mxu1 }
 0x14d   :  { %v2494_v49 = vpack.c.bf16 %v1879_v57, %v1879_v57  ;;  %v1880_v19 = vmax.f32 %v1837_v37, 0.0  ;;  %v1240_v41 = vadd.f32 %v2727_v17, %v3273_v29  ;;  %v1709_v61 = vadd.f32 %v2773_v18, %v3273_v29  ;;  %v1231_v62 = vpop.f32.mrb[57].mxu0  ;;  %v1700_v42 = vpop.f32.mrb[57].mxu1 }
 0x14e   :  { %v2492_v31 = vpack.c.bf16 %v1877_v45, %v1877_v45  ;;  %v1878_v24 = vmax.f32 %v1835_v60, 0.0  ;;  %v1232_v22 = vadd.f32 %v3273_v29, %v1231_v62  ;;  %v1701_v23 = vadd.f32 %v3273_v29, %v1700_v42  ;;  %v2728_v7 = vpop.f32.mrb[58].mxu0  ;;  %v2774_v46 = vpop.f32.mrb[58].mxu1 }
 0x14f   :  { %2096 = vst.msk [vmem:[%s4013_s3 + $0x28] sm:$0xf] %vm2085_vm3, %v2494_v49  ;;  %v2495_v47 = vpack.c.bf16 %v1880_v19, %v1880_v19  ;;  %v1371_v34 = vmax.f32 %v4110_v21, %v1240_v41  ;;  %v1243_v2 = vadd.f32 %v2728_v7, %v3273_v29  ;;  %v1234_v3 = vpop.f32.mrb[59].mxu0  ;;  %v1703_v54 = vpop.f32.mrb[59].mxu1  ;;  %v1712_v48 = vadd.f32 %v2774_v46, %v3273_v29 }
 0x150   :  { %2094 = vst.msk [vmem:[%s4013_s3 + $0x20] sm:$0xf] %vm2085_vm3, %v2492_v31  ;;  %v2493_v25 = vpack.c.bf16 %v1878_v24, %v1878_v24  ;;  %v1369_v40 = vmax.f32 %v4111_v5, %v1232_v22  ;;  %v1235_v27 = vadd.f32 %v3273_v29, %v1234_v3  ;;  %v1704_v33 = vadd.f32 %v3273_v29, %v1703_v54 }
 0x151   :  { %2097 = vst.msk [vmem:[%s4013_s3 + $0x2c] sm:$0xf] %vm2085_vm3, %v2495_v47  ;;  %v1840_v28 = vmax.f32 %v1371_v34, %v1709_v61  ;;  %v1372_v4 = vmax.f32 %v4112_v30, %v1243_v2  ;;  %v4114_v17 = vmax.f32 %v3404_v11, %v3407_v14  ;;  %v4115_v62 = vmax.f32 %v3410_v20, %v3413_v26 }
 0x152   :  { %2095 = vst.msk [vmem:[%s4013_s3 + $0x24] sm:$0xf] %vm2085_vm3, %v2493_v25  ;;  %v1838_v35 = vmax.f32 %v1369_v40, %v1701_v23  ;;  %v1370_v32 = vmax.f32 %v4113_v38, %v1235_v27  ;;  %v4116_v14 = vmax.f32 %v3418_v39, %v3421_v43  ;;  %v4117_v26 = vmax.f32 %v3426_v10, %v3429_v15 }
 0x153   :  { %v1883_v1 = vmax.f32 %v1840_v28, 0.0  ;;  %v1841_v16 = vmax.f32 %v1372_v4, %v1712_v48 }
 0x154   :  { %v1881_v52 = vmax.f32 %v1838_v35, 0.0  ;;  %v1839_v8 = vmax.f32 %v1370_v32, %v1704_v33  ;;  %v2731_v50 = vpop.f32.mrb[60].mxu0  ;;  %v2777_v51 = vpop.f32.mrb[60].mxu1  ;;  %v4118_v35 = vmax.f32 %v3436_v6, %v3439_v0  ;;  %v4120_v6 = vld [vmem:[#allocation2_spill] sm:$0xff] }
 0x155   :  { %v2498_v9 = vpack.c.bf16 %v1883_v1, %v1883_v1  ;;  %v1884_v53 = vmax.f32 %v1841_v16, 0.0  ;;  %v1256_v44 = vadd.f32 %v2731_v50, %v3273_v29  ;;  %v1725_v12 = vadd.f32 %v2777_v51, %v3273_v29  ;;  %v1247_v13 = vpop.f32.mrb[61].mxu0  ;;  %v1716_v36 = vpop.f32.mrb[61].mxu1  ;;  %v4121_v51 = vld [vmem:[#allocation3_spill] sm:$0xff] }
 0x156   :  { %v2496_v56 = vpack.c.bf16 %v1881_v52, %v1881_v52  ;;  %v1882_v57 = vmax.f32 %v1839_v8, 0.0  ;;  %v1248_v59 = vadd.f32 %v3273_v29, %v1247_v13  ;;  %v1717_v63 = vadd.f32 %v3273_v29, %v1716_v36  ;;  %v2732_v37 = vpop.f32.mrb[62].mxu0  ;;  %v2778_v45 = vpop.f32.mrb[62].mxu1 }
 0x157   :  { %2100 = vst.msk [vmem:[%s4013_s3 + $0x38] sm:$0xf] %vm2085_vm3, %v2498_v9  ;;  %v2499_v60 = vpack.c.bf16 %v1884_v53, %v1884_v53  ;;  %v1375_v18 = vmax.f32 %v4114_v17, %v1256_v44  ;;  %v1259_v49 = vadd.f32 %v2732_v37, %v3273_v29  ;;  %v1250_v19 = vpop.f32.mrb[63].mxu0  ;;  %v1719_v41 = vpop.f32.mrb[63].mxu1  ;;  %v1728_v22 = vadd.f32 %v2778_v45, %v3273_v29 }
 0x158   :  { %2098 = vst.msk [vmem:[%s4013_s3 + $0x30] sm:$0xf] %vm2085_vm3, %v2496_v56  ;;  %v2497_v61 = vpack.c.bf16 %v1882_v57, %v1882_v57  ;;  %v1373_v42 = vmax.f32 %v4115_v62, %v1248_v59  ;;  %v1251_v31 = vadd.f32 %v3273_v29, %v1250_v19  ;;  %v1720_v7 = vadd.f32 %v3273_v29, %v1719_v41 }
 0x159   :  { %2101 = vst.msk [vmem:[%s4013_s3 + $0x3c] sm:$0xf] %vm2085_vm3, %v2499_v60  ;;  %v1844_v11 = vmax.f32 %v1375_v18, %v1725_v12  ;;  %v1376_v24 = vmax.f32 %v4116_v14, %v1259_v49  ;;  %v4119_v52 = vmax.f32 %v3442_v58, %v3445_v55  ;;  %v4122_v9 = vmax.f32 %v4120_v6, %v4121_v51  ;;  %v4123_v55 = vld [vmem:[#allocation4_spill] sm:$0xff]  ;;  %v4124_v12 = vld [vmem:[#allocation5_spill] sm:$0xff] }
 0x15a   :  { %2099 = vst.msk [vmem:[%s4013_s3 + $0x34] sm:$0xf] %vm2085_vm3, %v2497_v61  ;;  %v1842_v20 = vmax.f32 %v1373_v42, %v1717_v63  ;;  %v1374_v23 = vmax.f32 %v4117_v26, %v1251_v31  ;;  %v4125_v13 = vmax.f32 %v4123_v55, %v4124_v12  ;;  %v4127_v26 = vld [vmem:[#allocation7_spill] sm:$0xff] }
 0x15b   :  { %v1887_v46 = vmax.f32 %v1844_v11, 0.0  ;;  %v1845_v47 = vmax.f32 %v1376_v24, %v1728_v22 }
 0x15c   :  { %v1885_v21 = vmax.f32 %v1842_v20, 0.0  ;;  %v1843_v34 = vmax.f32 %v1374_v23, %v1720_v7  ;;  %v2735_v39 = vpop.f32.mrb[64].mxu0  ;;  %v2781_v43 = vpop.f32.mrb[64].mxu1  ;;  %v4126_v20 = vld [vmem:[#allocation6_spill] sm:$0xff] }
 0x15d   :  { %v2502_v2 = vpack.c.bf16 %v1887_v46, %v1887_v46  ;;  %v1888_v3 = vmax.f32 %v1845_v47, 0.0  ;;  %v1272_v54 = vadd.f32 %v2735_v39, %v3273_v29  ;;  %v1741_v25 = vadd.f32 %v2781_v43, %v3273_v29  ;;  %v1263_v5 = vpop.f32.mrb[65].mxu0  ;;  %v1732_v40 = vpop.f32.mrb[65].mxu1  ;;  %v4129_v39 = vld [vmem:[#allocation8_spill] sm:$0xff]  ;;  %v4130_v43 = vld [vmem:[#allocation9_spill] sm:$0xff] }
 0x15e   :  { %v2500_v27 = vpack.c.bf16 %v1885_v21, %v1885_v21  ;;  %v1886_v28 = vmax.f32 %v1843_v34, 0.0  ;;  %v1264_v10 = vadd.f32 %v3273_v29, %v1263_v5  ;;  %v1733_v15 = vadd.f32 %v3273_v29, %v1732_v40  ;;  %v2736_v30 = vpop.f32.mrb[66].mxu0  ;;  %v2782_v4 = vpop.f32.mrb[66].mxu1  ;;  %v4132_v5 = vld [vmem:[#allocation10_spill] sm:$0xff]  ;;  %v4133_v40 = vld [vmem:[#allocation11_spill] sm:$0xff] }
 0x15f   :  { %2104 = vst.msk [vmem:[%s4013_s3 + $0x48] sm:$0xf] %vm2085_vm3, %v2502_v2  ;;  %v2503_v48 = vpack.c.bf16 %v1888_v3, %v1888_v3  ;;  %v1379_v38 = vmax.f32 %v4118_v35, %v1272_v54  ;;  %v1275_v32 = vadd.f32 %v2736_v30, %v3273_v29  ;;  %v1266_v33 = vpop.f32.mrb[67].mxu0  ;;  %v1735_v1 = vpop.f32.mrb[67].mxu1  ;;  %v1744_v44 = vadd.f32 %v2782_v4, %v3273_v29  ;;  %v4135_v30 = vld [vmem:[#allocation12_spill] sm:$0xff]  ;;  %v4136_v4 = vld [vmem:[#allocation13_spill] sm:$0xff] }
 0x160   :  { %2102 = vst.msk [vmem:[%s4013_s3 + $0x40] sm:$0xf] %vm2085_vm3, %v2500_v27  ;;  %v2501_v16 = vpack.c.bf16 %v1886_v28, %v1886_v28  ;;  %v1377_v8 = vmax.f32 %v4119_v52, %v1264_v10  ;;  %v1267_v50 = vadd.f32 %v3273_v29, %v1266_v33  ;;  %v1736_v56 = vadd.f32 %v3273_v29, %v1735_v1 }
 0x161   :  { %2105 = vst.msk [vmem:[%s4013_s3 + $0x4c] sm:$0xf] %vm2085_vm3, %v2503_v48  ;;  %v1848_v0 = vmax.f32 %v1379_v38, %v1741_v25  ;;  %v1380_v53 = vmax.f32 %v4122_v9, %v1275_v32  ;;  %v4128_v23 = vmax.f32 %v4126_v20, %v4127_v26  ;;  %v4131_v2 = vmax.f32 %v4129_v39, %v4130_v43  ;;  %v4147_v26 = vld [vmem:[#allocation20_spill] sm:$0xff] }
 0x162   :  { %2103 = vst.msk [vmem:[%s4013_s3 + $0x44] sm:$0xf] %vm2085_vm3, %v2501_v16  ;;  %v1846_v58 = vmax.f32 %v1377_v8, %v1733_v15  ;;  %v1378_v36 = vmax.f32 %v4125_v13, %v1267_v50  ;;  %v4134_v27 = vmax.f32 %v4132_v5, %v4133_v40  ;;  %v4137_v48 = vmax.f32 %v4135_v30, %v4136_v4 }
 0x163   :  { %v1891_v57 = vmax.f32 %v1848_v0, 0.0  ;;  %v1849_v59 = vmax.f32 %v1380_v53, %v1744_v44 }
 0x164   :  { %v1889_v63 = vmax.f32 %v1846_v58, 0.0  ;;  %v1847_v37 = vmax.f32 %v1378_v36, %v1736_v56  ;;  %v2739_v45 = vpop.f32.mrb[68].mxu0  ;;  %v2785_v60 = vpop.f32.mrb[68].mxu1 }
 0x165   :  { %v2506_v17 = vpack.c.bf16 %v1891_v57, %v1891_v57  ;;  %v1892_v18 = vmax.f32 %v1849_v59, 0.0  ;;  %v1288_v49 = vadd.f32 %v2739_v45, %v3273_v29  ;;  %v1757_v19 = vadd.f32 %v2785_v60, %v3273_v29  ;;  %v1279_v41 = vpop.f32.mrb[69].mxu0  ;;  %v1748_v61 = vpop.f32.mrb[69].mxu1  ;;  %v4138_v57 = vld [vmem:[#allocation14_spill] sm:$0xff]  ;;  %v4139_v59 = vld [vmem:[#allocation15_spill] sm:$0xff] }
 0x166   :  { %v2504_v62 = vpack.c.bf16 %v1889_v63, %v1889_v63  ;;  %v1890_v42 = vmax.f32 %v1847_v37, 0.0  ;;  %v1280_v31 = vadd.f32 %v3273_v29, %v1279_v41  ;;  %v1749_v11 = vadd.f32 %v3273_v29, %v1748_v61  ;;  %v2740_v14 = vpop.f32.mrb[70].mxu0  ;;  %v2786_v24 = vpop.f32.mrb[70].mxu1 }
 0x167   :  { %2108 = vst.msk [vmem:[%s4013_s3 + $0x58] sm:$0xf] %vm2085_vm3, %v2506_v17  ;;  %v2507_v22 = vpack.c.bf16 %v1892_v18, %v1892_v18  ;;  %v1383_v7 = vmax.f32 %v4128_v23, %v1288_v49  ;;  %v1291_v46 = vadd.f32 %v2740_v14, %v3273_v29  ;;  %v1282_v47 = vpop.f32.mrb[71].mxu0  ;;  %v1751_v21 = vpop.f32.mrb[71].mxu1  ;;  %v1760_v10 = vadd.f32 %v2786_v24, %v3273_v29  ;;  %v4141_v49 = vld [vmem:[#allocation16_spill] sm:$0xff]  ;;  %v4148_v23 = vld [vmem:[#allocation21_spill] sm:$0xff] }
 0x168   :  { %2106 = vst.msk [vmem:[%s4013_s3 + $0x50] sm:$0xf] %vm2085_vm3, %v2504_v62  ;;  %v2505_v34 = vpack.c.bf16 %v1890_v42, %v1890_v42  ;;  %v1381_v3 = vmax.f32 %v4131_v2, %v1280_v31  ;;  %v1283_v54 = vadd.f32 %v3273_v29, %v1282_v47  ;;  %v1752_v38 = vadd.f32 %v3273_v29, %v1751_v21  ;;  %v4144_v31 = vld [vmem:[#allocation18_spill] sm:$0xff] }
 0x169   :  { %2109 = vst.msk [vmem:[%s4013_s3 + $0x5c] sm:$0xf] %vm2085_vm3, %v2507_v22  ;;  %v1852_v25 = vmax.f32 %v1383_v7, %v1757_v19  ;;  %v1384_v28 = vmax.f32 %v4134_v27, %v1291_v46  ;;  %v4140_v63 = vmax.f32 %v4138_v57, %v4139_v59  ;;  %v4142_v19 = vld [vmem:[#allocation17_spill] sm:$0xff]  ;;  %v4149_v7 = vmax.f32 %v4147_v26, %v4148_v23  ;;  %v4159_v59 = vld [vmem:[#allocation28_spill] sm:$0xff] }
 0x16a   :  { %2107 = vst.msk [vmem:[%s4013_s3 + $0x54] sm:$0xf] %vm2085_vm3, %v2505_v34  ;;  %v1850_v15 = vmax.f32 %v1381_v3, %v1749_v11  ;;  %v1382_v35 = vmax.f32 %v4137_v48, %v1283_v54  ;;  %v4143_v41 = vmax.f32 %v4141_v49, %v4142_v19  ;;  %v4145_v11 = vld [vmem:[#allocation19_spill] sm:$0xff] }
 0x16b   :  { %v1895_v32 = vmax.f32 %v1852_v25, 0.0  ;;  %v1853_v33 = vmax.f32 %v1384_v28, %v1760_v10  ;;  %v4146_v14 = vmax.f32 %v4144_v31, %v4145_v11 }
 0x16c   :  { %v1893_v1 = vmax.f32 %v1850_v15, 0.0  ;;  %v1851_v16 = vmax.f32 %v1382_v35, %v1752_v38  ;;  %v2743_v52 = vpop.f32.mrb[72].mxu0  ;;  %v2789_v8 = vpop.f32.mrb[72].mxu1 }
 0x16d   :  { %v2510_v50 = vpack.c.bf16 %v1895_v32, %v1895_v32  ;;  %v1896_v0 = vmax.f32 %v1853_v33, 0.0  ;;  %v1304_v6 = vadd.f32 %v2743_v52, %v3273_v29  ;;  %v1773_v51 = vadd.f32 %v2789_v8, %v3273_v29  ;;  %v1295_v9 = vpop.f32.mrb[73].mxu0  ;;  %v1764_v53 = vpop.f32.mrb[73].mxu1  ;;  %v4150_v32 = vld [vmem:[#allocation22_spill] sm:$0xff]  ;;  %v4151_v33 = vld [vmem:[#allocation23_spill] sm:$0xff] }
 0x16e   :  { %v2508_v44 = vpack.c.bf16 %v1893_v1, %v1893_v1  ;;  %v1894_v58 = vmax.f32 %v1851_v16, 0.0  ;;  %v1296_v55 = vadd.f32 %v3273_v29, %v1295_v9  ;;  %v1765_v12 = vadd.f32 %v3273_v29, %v1764_v53  ;;  %v2744_v13 = vpop.f32.mrb[74].mxu0  ;;  %v2790_v36 = vpop.f32.mrb[74].mxu1  ;;  %v3905_v52 = vld [vmem:[%s4012_s2] ss:$0 sm:$0xff] }
 0x16f   :  { %2112 = vst.msk [vmem:[%s4013_s3 + $0x68] sm:$0xf] %vm2085_vm3, %v2510_v50  ;;  %v2511_v56 = vpack.c.bf16 %v1896_v0, %v1896_v0  ;;  %v1387_v37 = vmax.f32 %v4140_v63, %v1304_v6  ;;  %v1307_v45 = vadd.f32 %v2744_v13, %v3273_v29  ;;  %v1298_v60 = vpop.f32.mrb[75].mxu0  ;;  %v1767_v17 = vpop.f32.mrb[75].mxu1  ;;  %v1776_v22 = vadd.f32 %v2790_v36, %v3273_v29  ;;  %v4153_v6 = vld [vmem:[#allocation24_spill] sm:$0xff]  ;;  %v4160_v63 = vld [vmem:[#allocation29_spill] sm:$0xff] }
 0x170   :  { %2110 = vst.msk [vmem:[%s4013_s3 + $0x60] sm:$0xf] %vm2085_vm3, %v2508_v44  ;;  %v2509_v18 = vpack.c.bf16 %v1894_v58, %v1894_v58  ;;  %v1385_v61 = vmax.f32 %v4143_v41, %v1296_v55  ;;  %v1299_v62 = vadd.f32 %v3273_v29, %v1298_v60  ;;  %v1768_v47 = vadd.f32 %v3273_v29, %v1767_v17  ;;  %v4156_v55 = vld [vmem:[#allocation26_spill] sm:$0xff] }
 0x171   :  { %2113 = vst.msk [vmem:[%s4013_s3 + $0x6c] sm:$0xf] %vm2085_vm3, %v2511_v56  ;;  %v1856_v42 = vmax.f32 %v1387_v37, %v1773_v51  ;;  %v1388_v24 = vmax.f32 %v4146_v14, %v1307_v45  ;;  %v4152_v1 = vmax.f32 %v4150_v32, %v4151_v33  ;;  %v4154_v51 = vld [vmem:[#allocation25_spill] sm:$0xff]  ;;  %v4161_v37 = vmax.f32 %v4159_v59, %v4160_v63  ;;  %v4171_v33 = vld [vmem:[#allocation36_spill] sm:$0xff] }
 0x172   :  { %2111 = vst.msk [vmem:[%s4013_s3 + $0x64] sm:$0xf] %vm2085_vm3, %v2509_v18  ;;  %v1854_v20 = vmax.f32 %v1385_v61, %v1765_v12  ;;  %v1386_v46 = vmax.f32 %v4149_v7, %v1299_v62  ;;  %v4155_v9 = vmax.f32 %v4153_v6, %v4154_v51  ;;  %v4157_v12 = vld [vmem:[#allocation27_spill] sm:$0xff] }
 0x173   :  { %v1899_v21 = vmax.f32 %v1856_v42, 0.0  ;;  %v1857_v34 = vmax.f32 %v1388_v24, %v1776_v22  ;;  %v4158_v13 = vmax.f32 %v4156_v55, %v4157_v12 }
 0x174   :  { %v1897_v39 = vmax.f32 %v1854_v20, 0.0  ;;  %v1855_v43 = vmax.f32 %v1386_v46, %v1768_v47  ;;  %v2747_v2 = vpop.f32.mrb[76].mxu0  ;;  %v2793_v3 = vpop.f32.mrb[76].mxu1 }
 0x175   :  { %v2514_v54 = vpack.c.bf16 %v1899_v21, %v1899_v21  ;;  %v1900_v25 = vmax.f32 %v1857_v34, 0.0  ;;  %v1320_v5 = vadd.f32 %v2747_v2, %v3273_v29  ;;  %v1789_v40 = vadd.f32 %v2793_v3, %v3273_v29  ;;  %v1311_v27 = vpop.f32.mrb[77].mxu0  ;;  %v1780_v28 = vpop.f32.mrb[77].mxu1  ;;  %v4162_v21 = vld [vmem:[#allocation30_spill] sm:$0xff]  ;;  %v4163_v34 = vld [vmem:[#allocation31_spill] sm:$0xff] }
 0x176   :  { %v2512_v10 = vpack.c.bf16 %v1897_v39, %v1897_v39  ;;  %v1898_v15 = vmax.f32 %v1855_v43, 0.0  ;;  %v1312_v30 = vadd.f32 %v3273_v29, %v1311_v27  ;;  %v1781_v4 = vadd.f32 %v3273_v29, %v1780_v28  ;;  %v2748_v48 = vpop.f32.mrb[78].mxu0  ;;  %v2794_v35 = vpop.f32.mrb[78].mxu1 }
 0x177   :  { %2116 = vst.msk [vmem:[%s4013_s3 + $0x78] sm:$0xf] %vm2085_vm3, %v2514_v54  ;;  %v2515_v38 = vpack.c.bf16 %v1900_v25, %v1900_v25  ;;  %v1391_v16 = vmax.f32 %v4152_v1, %v1320_v5  ;;  %v1323_v8 = vadd.f32 %v3905_v52, %v2748_v48  ;;  %v1314_v29 = vpop.f32.mrb[79].mxu0  ;;  %v1783_v50 = vpop.f32.mrb[79].mxu1  ;;  %v1792_v56 = vadd.f32 %v3905_v52, %v2794_v35  ;;  %v4165_v5 = vld [vmem:[#allocation32_spill] sm:$0xff]  ;;  %v4172_v1 = vld [vmem:[#allocation37_spill] sm:$0xff] }
 0x178   :  { %2114 = vst.msk [vmem:[%s4013_s3 + $0x70] sm:$0xf] %vm2085_vm3, %v2512_v10  ;;  %v2513_v0 = vpack.c.bf16 %v1898_v15, %v1898_v15  ;;  %v1389_v53 = vmax.f32 %v4155_v9, %v1312_v30  ;;  %v1315_v44 = vadd.f32 %v3905_v52, %v1314_v29  ;;  %v1784_v60 = vadd.f32 %v3905_v52, %v1783_v50  ;;  %v4168_v30 = vld [vmem:[#allocation34_spill] sm:$0xff] }
 0x179   :  { %2117 = vst.msk [vmem:[%s4013_s3 + $0x7c] sm:$0xf] %vm2085_vm3, %v2515_v38  ;;  %v1860_v58 = vmax.f32 %v1391_v16, %v1789_v40  ;;  %v1392_v36 = vmax.f32 %v4158_v13, %v1323_v8  ;;  %v4164_v39 = vmax.f32 %v4162_v21, %v4163_v34  ;;  %v4166_v40 = vld [vmem:[#allocation33_spill] sm:$0xff]  ;;  %v4173_v16 = vmax.f32 %v4171_v33, %v4172_v1 }
 0x17a   :  { %2115 = vst.msk [vmem:[%s4013_s3 + $0x74] sm:$0xf] %vm2085_vm3, %v2513_v0  ;;  %v1858_v57 = vmax.f32 %v1389_v53, %v1781_v4  ;;  %v1390_v45 = vmax.f32 %v4161_v37, %v1315_v44  ;;  %v4167_v27 = vmax.f32 %v4165_v5, %v4166_v40  ;;  %v4169_v4 = vld [vmem:[#allocation35_spill] sm:$0xff] }
 0x17b   :  { %v1903_v17 = vmax.f32 %v1860_v58, 0.0  ;;  %v1861_v18 = vmax.f32 %v1392_v36, %v1792_v56  ;;  %v4170_v48 = vmax.f32 %v4168_v30, %v4169_v4 }
 0x17c   :  { %v1901_v49 = vmax.f32 %v1858_v57, 0.0  ;;  %v1859_v19 = vmax.f32 %v1390_v45, %v1784_v60  ;;  %v2751_v41 = vpop.f32.mrb[80].mxu0  ;;  %v2797_v61 = vpop.f32.mrb[80].mxu1 }
 0x17d   :  { %v2518_v62 = vpack.c.bf16 %v1903_v17, %v1903_v17  ;;  %v1904_v42 = vmax.f32 %v1861_v18, 0.0  ;;  %v1336_v31 = vadd.f32 %v3905_v52, %v2751_v41  ;;  %v1805_v11 = vadd.f32 %v3905_v52, %v2797_v61  ;;  %v1327_v14 = vpop.f32.mrb[81].mxu0  ;;  %v1796_v24 = vpop.f32.mrb[81].mxu1  ;;  %v4174_v17 = vld [vmem:[#allocation38_spill] sm:$0xff]  ;;  %v4175_v18 = vld [vmem:[#allocation39_spill] sm:$0xff] }
 0x17e   :  { %v2516_v22 = vpack.c.bf16 %v1901_v49, %v1901_v49  ;;  %v1902_v20 = vmax.f32 %v1859_v19, 0.0  ;;  %v1328_v26 = vadd.f32 %v3905_v52, %v1327_v14  ;;  %v1797_v23 = vadd.f32 %v3905_v52, %v1796_v24  ;;  %v2752_v7 = vpop.f32.mrb[82].mxu0  ;;  %v2798_v46 = vpop.f32.mrb[82].mxu1 }
 0x17f   :  { %2120 = vst.msk [vmem:[%s4013_s3 + $0x88] sm:$0xf] %vm2085_vm3, %v2518_v62  ;;  %v2519_v47 = vpack.c.bf16 %v1904_v42, %v1904_v42  ;;  %v1395_v43 = vmax.f32 %v4164_v39, %v1336_v31  ;;  %v1339_v2 = vadd.f32 %v3905_v52, %v2752_v7  ;;  %v1330_v3 = vpop.f32.mrb[83].mxu0  ;;  %v1799_v54 = vpop.f32.mrb[83].mxu1  ;;  %v1808_v38 = vadd.f32 %v3905_v52, %v2798_v46  ;;  %v4177_v42 = vld [vmem:[#allocation40_spill] sm:$0xff]  ;;  %v4178_v31 = vld [vmem:[#allocation41_spill] sm:$0xff] }
 0x180   :  { %2118 = vst.msk [vmem:[%s4013_s3 + $0x80] sm:$0xf] %vm2085_vm3, %v2516_v22  ;;  %v2517_v25 = vpack.c.bf16 %v1902_v20, %v1902_v20  ;;  %v1393_v28 = vmax.f32 %v4167_v27, %v1328_v26  ;;  %v1331_v10 = vadd.f32 %v3905_v52, %v1330_v3  ;;  %v1800_v29 = vadd.f32 %v3905_v52, %v1799_v54  ;;  %v4180_v26 = vld [vmem:[#allocation42_spill] sm:$0xff] }
 0x181   :  { %2121 = vst.msk [vmem:[%s4013_s3 + $0x8c] sm:$0xf] %vm2085_vm3, %v2519_v47  ;;  %v1864_v15 = vmax.f32 %v1395_v43, %v1805_v11  ;;  %v1396_v35 = vmax.f32 %v4170_v48, %v1339_v2  ;;  %v4176_v49 = vmax.f32 %v4174_v17, %v4175_v18  ;;  %v4179_v11 = vmax.f32 %v4177_v42, %v4178_v31 }
 0x182   :  { %2119 = vst.msk [vmem:[%s4013_s3 + $0x84] sm:$0xf] %vm2085_vm3, %v2517_v25  ;;  %v1862_v32 = vmax.f32 %v1393_v28, %v1797_v23  ;;  %v1394_v8 = vmax.f32 %v4173_v16, %v1331_v10  ;;  %v4181_v23 = vld [vmem:[#allocation43_spill] sm:$0xff] }
 0x183   :  { %v1907_v50 = vmax.f32 %v1864_v15, 0.0  ;;  %v1865_v0 = vmax.f32 %v1396_v35, %v1808_v38  ;;  %v4182_v7 = vmax.f32 %v4180_v26, %v4181_v23 }
 0x184   :  { %v1905_v6 = vmax.f32 %v1862_v32, 0.0  ;;  %v1863_v51 = vmax.f32 %v1394_v8, %v1800_v29  ;;  %v2755_v9 = vpop.f32.mrb[84].mxu0  ;;  %v2801_v53 = vpop.f32.mrb[84].mxu1 }
 0x185   :  { %v2522_v44 = vpack.c.bf16 %v1907_v50, %v1907_v50  ;;  %v1908_v58 = vmax.f32 %v1865_v0, 0.0  ;;  %v1352_v55 = vadd.f32 %v3905_v52, %v2755_v9  ;;  %v1821_v12 = vadd.f32 %v3905_v52, %v2801_v53  ;;  %v1343_v13 = vpop.f32.mrb[85].mxu0  ;;  %v1812_v36 = vpop.f32.mrb[85].mxu1 }
 0x186   :  { %v2520_v56 = vpack.c.bf16 %v1905_v6, %v1905_v6  ;;  %v1906_v57 = vmax.f32 %v1863_v51, 0.0  ;;  %v1344_v59 = vadd.f32 %v3905_v52, %v1343_v13  ;;  %v1813_v63 = vadd.f32 %v3905_v52, %v1812_v36  ;;  %v2756_v37 = vpop.f32.mrb[86].mxu0  ;;  %v2802_v45 = vpop.f32.mrb[86].mxu1 }
 0x187   :  { %2124 = vst.msk [vmem:[%s4013_s3 + $0x98] sm:$0xf] %vm2085_vm3, %v2522_v44  ;;  %v2523_v60 = vpack.c.bf16 %v1908_v58, %v1908_v58  ;;  %v1399_v19 = vmax.f32 %v4176_v49, %v1352_v55  ;;  %v1346_v41 = vpop.f32.mrb[87].mxu0  ;;  %v1815_v61 = vpop.f32.mrb[87].mxu1 }
 0x188   :  { %2122 = vst.msk [vmem:[%s4013_s3 + $0x90] sm:$0xf] %vm2085_vm3, %v2520_v56  ;;  %v2521_v62 = vpack.c.bf16 %v1906_v57, %v1906_v57  ;;  %v1397_v14 = vmax.f32 %v4179_v11, %v1344_v59  ;;  %v1347_v24 = vadd.f32 %v3905_v52, %v1346_v41  ;;  %v1816_v47 = vadd.f32 %v3905_v52, %v1815_v61 }
 0x189   :  { %2125 = vst.msk [vmem:[%s4013_s3 + $0x9c] sm:$0xf] %vm2085_vm3, %v2523_v60  ;;  %v1868_v22 = vmax.f32 %v1399_v19, %v1821_v12 }
 0x18a   :  { %2123 = vst.msk [vmem:[%s4013_s3 + $0x94] sm:$0xf] %vm2085_vm3, %v2521_v62  ;;  %v1866_v20 = vmax.f32 %v1397_v14, %v1813_v63  ;;  %v1398_v46 = vmax.f32 %v4182_v7, %v1347_v24 }
 0x18b   :  { %v1911_v21 = vmax.f32 %v1868_v22, 0.0 }
 0x18c   :  { %v1909_v34 = vmax.f32 %v1866_v20, 0.0  ;;  %v1867_v39 = vmax.f32 %v1398_v46, %v1816_v47 }
 0x18d   :  { %v2526_v43 = vpack.c.bf16 %v1911_v21, %v1911_v21 }
 0x18e   :  { %v2524_v2 = vpack.c.bf16 %v1909_v34, %v1909_v34  ;;  %v1910_v3 = vmax.f32 %v1867_v39, 0.0 }
 0x18f   :  { %2129 = vst.msk [vmem:[%s4013_s3 + $0xa8] sm:$0x1] %vm2128_vm4, %v2526_v43 }
 0x190   :  { %2126 = vst.msk [vmem:[%s4013_s3 + $0xa0] sm:$0xf] %vm2085_vm3, %v2524_v2  ;;  %v2525_v54 = vpack.c.bf16 %v1910_v3, %v1910_v3 }
 0x192   :  { %2127 = vst.msk [vmem:[%s4013_s3 + $0xa4] sm:$0xf] %vm2085_vm3, %v2525_v54 }

// kernel: cnn_forward.5
= control target key start
LH: loop header
LB: loop body
LE: loop exit
PB: predicated region body
PF: predicated region fallthrough
CT: control target
= control target key end

     0   :  { %v129_v29 = vlaneseq  ;;  %v866_v33 = vmov 1966171168   ;;  %v867_v40 = vmov 0.0   ;;  %vm868_vm0 = vmmov 0   ;;  %s1058_s0 = inlined_call_operand.vmem [shape: bf16[2,800], index: 0, kind: input, shape index: {}]   ;;  %s1059_s1 = inlined_call_operand.vmem [shape: bf16[800,128], index: 1, kind: input, shape index: {}]   ;;  %s1060_s2 = inlined_call_operand.vmem [shape: f32[1,128], index: 2, kind: input, shape index: {}]   ;;  %s1061_s3 = inlined_call_operand.hbm [shape: f32[2,128], index: 3, kind: output, shape index: {}]  }
   0x1   :  { %v791_v0 = vld [vmem:[%s1059_s1 + $0x40] sm:$0xff]   ;;  %v795_v4 = vld [vmem:[%s1059_s1 + $0x48] sm:$0xff]   ;;  %v799_v8 = vld [vmem:[%s1059_s1 + $0x50] sm:$0xff]   ;;  %v127_v34 = vunpack.c.l.s4 %v866_v33 }
   0x2   :  { %v792_v1 = vld [vmem:[%s1059_s1] sm:$0xff]   ;;  %710 = vmatprep.subr.bf16.mxu0 %v791_v0  ;;  %v796_v5 = vld [vmem:[%s1059_s1 + $0x8] sm:$0xff]   ;;  %v800_v9 = vld [vmem:[%s1059_s1 + $0x10] sm:$0xff]   ;;  %v130_v35 = vshrl.u32 %v129_v29, 7 }
   0x3   :  { %v793_v2 = vld [vmem:[%s1059_s1 + $0xc0] sm:$0xff]   ;;  %711 = vmatpush3.bf16.msra.mxu0 %v792_v1  ;;  %v797_v6 = vld [vmem:[%s1059_s1 + $0xc8] sm:$0xff]   ;;  %v801_v10 = vld [vmem:[%s1059_s1 + $0xd0] sm:$0xff]   ;;  %v128_v39 = vunpack.c.0.s8 %v127_v34 }
   0x4   :  { %v794_v3 = vld [vmem:[%s1059_s1 + $0x80] sm:$0xff]   ;;  %732 = vmatprep.subr.bf16.mxu1 %v793_v2  ;;  %712 = vmatprep.subr.bf16.mxu0 %v795_v4  ;;  %v798_v7 = vld [vmem:[%s1059_s1 + $0x88] sm:$0xff]   ;;  %v802_v11 = vld [vmem:[%s1059_s1 + $0x90] sm:$0xff]  }
   0x5   :  { %733 = vmatpush3.bf16.msra.mxu1 %v794_v3  ;;  %v803_v12 = vld [vmem:[%s1059_s1 + $0x58] sm:$0xff]   ;;  %v807_v16 = vld [vmem:[%s1059_s1 + $0x60] sm:$0xff]   ;;  %v811_v20 = vld [vmem:[%s1059_s1 + $0x68] sm:$0xff]   ;;  %v131_v41 = vsub.s32 %v128_v39, %v130_v35 }
   0x6   :  { %734 = vmatprep.subr.bf16.mxu1 %v797_v6  ;;  %v804_v13 = vld [vmem:[%s1059_s1 + $0x18] sm:$0xff]   ;;  %v808_v17 = vld [vmem:[%s1059_s1 + $0x20] sm:$0xff]   ;;  %v812_v21 = vld [vmem:[%s1059_s1 + $0x28] sm:$0xff]  }
   0x7   :  { %713 = vmatpush3.bf16.msra.mxu0 %v796_v5  ;;  %v805_v14 = vld [vmem:[%s1059_s1 + $0xd8] sm:$0xff]   ;;  %v809_v18 = vld [vmem:[%s1059_s1 + $0xe0] sm:$0xff]   ;;  %v813_v22 = vld [vmem:[%s1059_s1 + $0xe8] sm:$0xff]  }
   0x8   :  { %714 = vmatprep.subr.bf16.mxu0 %v799_v8  ;;  %v806_v15 = vld [vmem:[%s1059_s1 + $0x98] sm:$0xff]   ;;  %v810_v19 = vld [vmem:[%s1059_s1 + $0xa0] sm:$0xff]   ;;  %v814_v23 = vld [vmem:[%s1059_s1 + $0xa8] sm:$0xff]  }
   0x9   :  { %735 = vmatpush3.bf16.msra.mxu1 %v798_v7  ;;  %v815_v24 = vld [vmem:[%s1059_s1 + $0x70] sm:$0xff]   ;;  %v819_v28 = vld [vmem:[%s1059_s1 + $0x78] sm:$0xff]   ;;  %v16_v32 = vld [vmem:[%s1058_s0] sm:$0x7f] }
   0xa   :  { %736 = vmatprep.subr.bf16.mxu1 %v801_v10  ;;  %v816_v25 = vld [vmem:[%s1059_s1 + $0x30] sm:$0xff]   ;;  %v820_v30 = vld [vmem:[%s1059_s1 + $0x38] sm:$0xff]   ;;  %v824_v37 = vld [vmem:[%s1059_s1 + $0x140] sm:$0xff]   ;;  %v125_v38 = vcombine.high %v16_v32, %v16_v32  ;;  %v132_v42 = vrot.slane %v16_v32, %v131_v41 }
   0xb   :  { %715 = vmatpush3.bf16.msra.mxu0 %v800_v9  ;;  %v817_v26 = vld [vmem:[%s1059_s1 + $0xf0] sm:$0xff]   ;;  %v821_v31 = vld [vmem:[%s1059_s1 + $0xf8] sm:$0xff]   ;;  %v825_v48 = vld [vmem:[%s1059_s1 + $0x100] sm:$0xff]  }
   0xc   :  { %716 = vmatprep.subr.bf16.mxu0 %v803_v12  ;;  %v818_v27 = vld [vmem:[%s1059_s1 + $0xb0] sm:$0xff]   ;;  %v823_v36 = vld [vmem:[%s1059_s1 + $0xb8] sm:$0xff]   ;;  %v139_v43 = vrot.slane %v125_v38, %v131_v41  ;;  %v140_v44 = vcombine.high %v132_v42, %v132_v42  ;;  %v148_v45 = vrot.slane %v132_v42, %v131_v41  ;;  %v826_v50 = vld [vmem:[%s1059_s1 + $0x148] sm:$0xff]  }
   0xd   :  { %737 = vmatpush3.bf16.msra.mxu1 %v802_v11  ;;  %v827_v53 = vld [vmem:[%s1059_s1 + $0x108] sm:$0xff]   ;;  %v828_v54 = vld [vmem:[%s1059_s1 + $0x150] sm:$0xff]   ;;  %v838_v55 = vld [vmem:[%s1059_s1 + $0x180] sm:$0xff]  }
   0xe   :  { %738 = vmatprep.subr.bf16.mxu1 %v805_v14  ;;  %v141_v46 = vcombine.high %v139_v43, %v139_v43  ;;  %v162_v47 = vrot.slane %v140_v44, %v131_v41  ;;  %v170_v49 = vcombine.high %v148_v45, %v148_v45  ;;  %v155_v56 = vrot.slane %v139_v43, %v131_v41  ;;  %v829_v57 = vld [vmem:[%s1059_s1 + $0x110] sm:$0xff]   ;;  %v841_v58 = vld [vmem:[%s1059_s1 + $0x188] sm:$0xff]  }
   0xf   :  { %717 = vmatpush3.bf16.msra.mxu0 %v804_v13 }
  0x10   :  { %718 = vmatprep.subr.bf16.mxu0 %v807_v16  ;;  %515 = vmatprep.mubr.bf16.mxu0 %v162_v47  ;;  %v172_v51 = vcombine.high %v162_v47, %v162_v47  ;;  %v169_v52 = vrot.slane %v141_v46, %v131_v41 }
  0x11   :  { %739 = vmatpush3.bf16.msra.mxu1 %v806_v15 }
  0x12   :  { %740 = vmatprep.subr.bf16.mxu1 %v809_v18  ;;  %555 = vmatprep.mubr.bf16.mxu1 %v172_v51 }
  0x13   :  { %719 = vmatpush3.bf16.msra.mxu0 %v808_v17 }
  0x14   :  { %720 = vmatprep.subr.bf16.mxu0 %v811_v20 }
  0x15   :  { %741 = vmatpush3.bf16.msra.mxu1 %v810_v19 }
  0x16   :  { %742 = vmatprep.subr.bf16.mxu1 %v813_v22 }
  0x17   :  { %721 = vmatpush3.bf16.msra.mxu0 %v812_v21 }
  0x18   :  { %722 = vmatprep.subr.bf16.mxu0 %v815_v24 }
  0x19   :  { %743 = vmatpush3.bf16.msra.mxu1 %v814_v23 }
  0x1a   :  { %744 = vmatprep.subr.bf16.mxu1 %v817_v26 }
  0x1b   :  { %723 = vmatpush3.bf16.msra.mxu0 %v816_v25 }
  0x1c   :  { %724 = vmatprep.subr.bf16.mxu0 %v819_v28 }
  0x1d   :  { %745 = vmatpush3.bf16.msra.mxu1 %v818_v27 }
  0x1e   :  { %746 = vmatprep.subr.bf16.mxu1 %v821_v31 }
  0x1f   :  { %725 = vmatpush3.bf16.msra.mxu0 %v820_v30 }
  0x20   :  { %754 = vmatprep.subr.bf16.mxu0 %v824_v37 }
  0x21   :  { %747 = vmatpush3.bf16.msra.mxu1 %v823_v36 }
  0x22   :  { %779 = vmatprep.subr.bf16.mxu1 %v867_v40  ;;  %516 = vmatmul.mubr.bf16.vlgmr.msra.gmra.mrb[0].mxu0 %v148_v45 }
  0x23   :  { %755 = vmatpush3.bf16.msra.mxu0 %v825_v48  ;;  %595 = vmatprep.mubr.bf16.mxu0 %v169_v52 }
  0x24   :  { %556 = vmatmul.mubr.bf16.vlgmr.msra.gmra.mrb[0].mxu1 %v170_v49  ;;  %756 = vmatprep.subr.bf16.mxu0 %v826_v50 }
  0x25   :  { %783 = vmatprep.mubr.msk.bf16.mxu1 %vm868_vm0, %v867_v40  ;;  %780 = vmatpush3.bf16.msra.mxu1 %v838_v55 }
  0x26   :  { %781 = vmatprep.subr.bf16.mxu1 %v867_v40 }
  0x27   :  { %757 = vmatpush3.bf16.msra.mxu0 %v827_v53 }
  0x28   :  { %8 = vsyncpa [#allocation3], 0  ;;  %758 = vmatprep.subr.bf16.mxu0 %v828_v54  ;;  %v830_v59 = vld [vmem:[%s1059_s1 + $0x158] sm:$0xff]   ;;  %v171_v60 = vcombine.high %v155_v56, %v155_v56  ;;  %vm479_vm1 = vcmask 261120   ;;  %v832_v62 = vld [vmem:[%s1059_s1 + $0x160] sm:$0xff]  }
  0x29   :  { %782 = vmatpush3.bf16.msra.mxu1 %v841_v58  ;;  %v831_v61 = vld [vmem:[%s1059_s1 + $0x118] sm:$0xff]   ;;  %v833_v63 = vld [vmem:[%s1059_s1 + $0x120] sm:$0xff]   ;;  %v834_v0 = vld [vmem:[%s1059_s1 + $0x168] sm:$0xff]  }
  0x2a   :  { %v835_v1 = vld [vmem:[%s1059_s1 + $0x128] sm:$0xff]   ;;  %v836_v2 = vld [vmem:[%s1059_s1 + $0x170] sm:$0xff]   ;;  %v839_v4 = vld [vmem:[%s1059_s1 + $0x178] sm:$0xff]  }
  0x2b   :  { %759 = vmatpush3.bf16.msra.mxu0 %v829_v57  ;;  %v837_v3 = vld [vmem:[%s1059_s1 + $0x130] sm:$0xff]   ;;  %v840_v5 = vld [vmem:[%s1059_s1 + $0x138] sm:$0xff]   ;;  %v658_v7 = vld [vmem:[%s1060_s2] ss:$0 sm:$0xff]  ;;  %s869_s1 = smov [#allocation2]  }
  0x2c   :  { %760 = vmatprep.subr.bf16.mxu0 %v830_v59  ;;  %784 = vmatmul.mubr.msk.bf16.vlgmr.msra.gmra.mrb[4].mxu1 %vm479_vm1, %v171_v60  ;;  %s650_s2 = sshll.u32 %s869_s1, 4  ;;  %s651_s2 = int_to_ptr.vmem [resolvable:$true] %s650_s2 }
  0x2d   :  { %s842_s6 = scalar_lea.vmem %s651_s2, 32  ;;  %p847_p1 = scmp.lt.s32.totalorder %s651_s2, %s651_s2 }
  0x2e   :  { %p843_p0 = scmp.ne.s32.totalorder %s651_s2, %s842_s6  ;;  %p848_p2 = scmp.lt.s32.totalorder %s842_s6, %s842_s6 }
  0x2f   :  { %761 = vmatpush3.bf16.msra.mxu0 %v831_v61 }
  0x30   :  { %762 = vmatprep.subr.bf16.mxu0 %v832_v62  ;;  %p849_p3 = por %p848_p2, %p847_p1 }
  0x32   :  { %p850_p4 = pnand %p849_p3, %p843_p0 }
  0x33   :  { %763 = vmatpush3.bf16.msra.mxu0 %v833_v63 }
  0x34   :  { %764 = vmatprep.subr.bf16.mxu0 %v834_v0 }
  0x37   :  { %765 = vmatpush3.bf16.msra.mxu0 %v835_v1 }
  0x38   :  { %766 = vmatprep.subr.bf16.mxu0 %v836_v2 }
  0x3b   :  { %767 = vmatpush3.bf16.msra.mxu0 %v837_v3 }
  0x3c   :  { %768 = vmatprep.subr.bf16.mxu0 %v839_v4 }
  0x3f   :  { %769 = vmatpush3.bf16.msra.mxu0 %v840_v5 }
  0x42   :  { %596 = vmatmul.mubr.bf16.vlgmr.msra.gmra.mrb[4].mxu0 %v155_v56 }
  0xf5   :  { %v726_v6 = vpop.f32.mrb[0].mxu0 }
  0xf6   :  { %v727_v8 = vpop.f32.mrb[1].mxu0 }
  0xf7   :  { %v728_v9 = vadd.f32 %v727_v8, %v726_v6  ;;  %v729_v10 = vpop.f32.mrb[2].mxu0  ;;  %v748_v11 = vpop.f32.mrb[0].mxu1 }
  0xf8   :  { %v730_v12 = vpop.f32.mrb[3].mxu0  ;;  %v749_v13 = vpop.f32.mrb[1].mxu1 }
  0xf9   :  { %v518_v14 = vadd.f32 %v728_v9, %v658_v7  ;;  %v750_v15 = vadd.f32 %v749_v13, %v748_v11  ;;  %v751_v16 = vpop.f32.mrb[2].mxu1 }
  0xfa   :  { %v752_v17 = vpop.f32.mrb[3].mxu1 }
  0xfb   :  { %v558_v18 = vadd.f32 %v750_v15, %v518_v14 }
  0xff   :  { %v637_v19 = vpop.f32.mrb[4].mxu1 }
 0x100   :  { %v785_v20 = vpop.f32.mrb[5].mxu1 }
 0x101   :  { %v640_v21 = vpop.f32.mrb[6].mxu1 }
 0x102   :  { %v786_v22 = vpop.f32.mrb[7].mxu1 }
 0x115   :  { %v770_v23 = vpop.f32.mrb[4].mxu0 }
 0x116   :  { %v771_v24 = vpop.f32.mrb[5].mxu0 }
 0x117   :  { %v772_v25 = vadd.f32 %v771_v24, %v770_v23  ;;  %v773_v26 = vpop.f32.mrb[6].mxu0 }
 0x118   :  { %v774_v27 = vpop.f32.mrb[7].mxu0 }
 0x119   :  { %v598_v28 = vadd.f32 %v772_v25, %v558_v18 }
 0x11b   :  { %v638_v29 = vadd.f32 %v637_v19, %v598_v28 }
 0x11d   :  { %643 = vst [vmem:[#allocation2] sm:$0x3] %v638_v29 }
 0x11e   :  { %853 = shalt.err (!%p850_p4)
}
 0x11f   :  { %s854_s9 = scalar_lea.hbm %s1061_s3, 32 }
 0x120   :  { %p855_p5 = scmp.ne.s32.totalorder %s1061_s3, %s854_s9  ;;  %p858_p6 = scmp.lt.u32.totalorder %s854_s9, %s1061_s3 }
 0x122   :  { %p860_p7 = pnand %p858_p6, %p855_p5 }
 0x124   :  { %863 = shalt.err (!%p860_p7)
}
 0x125   :  { %653 = dma.vmem_to_hbm [thread:$0]  %s651_s2, 32, %s1061_s3, [#allocation3]  }
 0x126   :  { %864 = dma.done.wait [#allocation3], 32  }
 0x127   :  { %865 = vsyncadd [#allocation3], 4294967264 }
 0x128   :  { %657 = vsyncpa [#allocation3], 1 }

// kernel: cnn_forward.4
= control target key start
LH: loop header
LB: loop body
LE: loop exit
PB: predicated region body
PF: predicated region fallthrough
CT: control target
= control target key end

     0   :  { %v779_v0 = vmov 0   ;;  %vm134_vm0 = vcmask 130048   ;;  %vm619_vm1 = vcmask 257024   ;;  %vm626_vm2 = vcmask 253952   ;;  %s1107_s1 = inlined_call_operand.vmem [shape: bf16[144,32], index: 1, kind: input, shape index: {}]   ;;  %s1108_s0 = inlined_call_operand.vmem [shape: bf16[4,50,144], index: 0, kind: input, shape index: {}]   ;;  %s1109_s2 = inlined_call_operand.vmem [shape: f32[1,32], index: 2, kind: input, shape index: {}]   ;;  %s1110_s3 = inlined_call_operand.vmem [shape: bf16[50,32], index: 3, kind: output, shape index: {}]  }
   0x1   :  { %147 = vmatprep.subr.bf16.mxu0 %v779_v0  ;;  %264 = vmatprep.subr.bf16.mxu1 %v779_v0  ;;  %v726_v1 = vld [vmem:[%s1107_s1] sm:$0xff]   ;;  %v727_v2 = vld [vmem:[%s1107_s1 + $0x8] sm:$0xff]   ;;  %v813_v3 = vld [vmem:[%s1107_s1 + $0x10] sm:$0xff]  }
   0x2   :  { %148 = vmatpush1.bf16.msra.mxu0 %v726_v1  ;;  %265 = vmatpush1.bf16.msra.mxu1 %v726_v1  ;;  %v820_v4 = vld [vmem:[%s1107_s1 + $0x18] sm:$0xff]   ;;  %v737_v5 = vld [vmem:[%s1108_s0 + $0x4] ss:$8 sps:$4 sm:$0xff]   ;;  %v857_v9 = vld [vmem:[%s1107_s1 + $0x30] sm:$0xff]  }
   0x3   :  { %149 = vmatprep.subr.bf16.mxu0 %v779_v0  ;;  %266 = vmatprep.subr.bf16.mxu1 %v779_v0  ;;  %v740_v6 = vld [vmem:[%s1108_s0 + $0x3c] ss:$8 sps:$4 sm:$0xff]   ;;  %v848_v8 = vld [vmem:[%s1107_s1 + $0x28] sm:$0xff]   ;;  %v738_v13 = vld [vmem:[%s1108_s0 + $0x38] ss:$8 sps:$4 sm:$0xff]  }
   0x4   :  { %650 = vmatprep.mubr.msk.bf16.mxu0 %vm134_vm0, %v737_v5  ;;  %669 = vmatprep.mubr.msk.bf16.mxu1 %vm134_vm0, %v740_v6  ;;  %v839_v7 = vld [vmem:[%s1107_s1 + $0x20] sm:$0xff]   ;;  %v866_v10 = vld [vmem:[%s1107_s1 + $0x38] sm:$0xff]   ;;  %v744_v15 = vld [vmem:[%s1108_s0 + $0x4c] ss:$8 sps:$4 sm:$0xff]  }
   0x5   :  { %v875_v11 = vld [vmem:[%s1107_s1 + $0x40] sm:$0xff]   ;;  %v741_v14 = vld [vmem:[%s1108_s0 + $0x14] ss:$8 sps:$4 sm:$0xff]   ;;  %v743_v16 = vld [vmem:[%s1108_s0 + $0x10] ss:$8 sps:$4 sm:$0xff]  }
   0x6   :  { %150 = vmatpush1.bf16.msra.mxu0 %v727_v2  ;;  %267 = vmatpush1.bf16.msra.mxu1 %v727_v2  ;;  %v735_v12 = vld [vmem:[%s1108_s0] ss:$8 sps:$4 sm:$0xff]   ;;  %v747_v18 = vld [vmem:[%s1108_s0 + $0x24] ss:$8 sps:$4 sm:$0xff]   ;;  %v40_v22 = vld [vmem:[%s1108_s0 + $0x30] sm:$0x11] }
   0x7   :  { %151 = vmatprep.subr.bf16.mxu0 %v779_v0  ;;  %268 = vmatprep.subr.bf16.mxu1 %v779_v0  ;;  %v746_v17 = vld [vmem:[%s1108_s0 + $0x48] ss:$8 sps:$4 sm:$0xff]   ;;  %v750_v19 = vld [vmem:[%s1108_s0 + $0x5c] ss:$8 sps:$4 sm:$0xff]   ;;  %v752_v21 = vld [vmem:[%s1108_s0 + $0x58] ss:$8 sps:$4 sm:$0xff]   ;;  %v640_v24 = vcombine.high %v40_v22, %v40_v22  ;;  %v639_v26 = vcombine.low %v40_v22, %v40_v22 }
   0x8   :  { %v749_v20 = vld [vmem:[%s1108_s0 + $0x20] ss:$8 sps:$4 sm:$0xff]   ;;  %v759_v28 = vld [vmem:[%s1108_s0 + $0x74] ss:$8 sps:$4 sm:$0xff]   ;;  %v757_v30 = vld [vmem:[%s1108_s0 + $0x70] ss:$8 sps:$4 sm:$0xff]  }
   0x9   :  { %v660_v23 = vld [vmem:[%s1108_s0 + $0x68] sm:$0x11]  ;;  %v765_v33 = vld [vmem:[%s1108_s0 + $0xbc] ss:$8 sps:$4 sm:$0xff]   ;;  %v768_v35 = vld [vmem:[%s1108_s0 + $0xb8] ss:$8 sps:$4 sm:$0xff]  }
   0xa   :  { %152 = vmatpush1.bf16.msra.mxu0 %v813_v3  ;;  %269 = vmatpush1.bf16.msra.mxu1 %v813_v3  ;;  %v668_v25 = vcombine.high %v660_v23, %v660_v23  ;;  %v667_v27 = vcombine.low %v660_v23, %v660_v23  ;;  %v762_v29 = vld [vmem:[%s1108_s0 + $0xac] ss:$8 sps:$4 sm:$0xff]   ;;  %v760_v31 = vld [vmem:[%s1108_s0 + $0xa8] ss:$8 sps:$4 sm:$0xff]   ;;  %v679_v38 = vld [vmem:[%s1108_s0 + $0xa0] sm:$0x11] }
   0xb   :  { %153 = vmatprep.subr.bf16.mxu0 %v779_v0  ;;  %270 = vmatprep.subr.bf16.mxu1 %v779_v0  ;;  %v763_v32 = vld [vmem:[%s1108_s0 + $0x84] ss:$8 sps:$4 sm:$0xff]   ;;  %v767_v34 = vld [vmem:[%s1108_s0 + $0x80] ss:$8 sps:$4 sm:$0xff]   ;;  %v769_v36 = vld [vmem:[%s1108_s0 + $0x94] ss:$8 sps:$4 sm:$0xff]   ;;  %v687_v42 = vcombine.high %v679_v38, %v679_v38  ;;  %v686_v44 = vcombine.low %v679_v38, %v679_v38 }
   0xc   :  { %v771_v37 = vld [vmem:[%s1108_s0 + $0xcc] ss:$8 sps:$4 sm:$0xff]   ;;  %v698_v39 = vld [vmem:[%s1108_s0 + $0xd8] sm:$0x11]  ;;  %v774_v41 = vld [vmem:[%s1108_s0 + $0xc8] ss:$8 sps:$4 sm:$0xff]  }
   0xd   :  { %v773_v40 = vld [vmem:[%s1108_s0 + $0x90] ss:$8 sps:$4 sm:$0xff]   ;;  %v706_v43 = vcombine.high %v698_v39, %v698_v39  ;;  %v705_v45 = vcombine.low %v698_v39, %v698_v39  ;;  %v1008_v46 = vld [vmem:[%s1109_s2] ss:$0 sm:$0xff] }
   0xe   :  { %154 = vmatpush1.bf16.msra.mxu0 %v820_v4  ;;  %271 = vmatpush1.bf16.msra.mxu1 %v820_v4 }
   0xf   :  { %155 = vmatprep.subr.bf16.mxu0 %v779_v0  ;;  %272 = vmatprep.subr.bf16.mxu1 %v779_v0 }
  0x12   :  { %156 = vmatpush1.bf16.msra.mxu0 %v839_v7  ;;  %273 = vmatpush1.bf16.msra.mxu1 %v839_v7 }
  0x13   :  { %157 = vmatprep.subr.bf16.mxu0 %v779_v0  ;;  %274 = vmatprep.subr.bf16.mxu1 %v779_v0 }
  0x16   :  { %158 = vmatpush1.bf16.msra.mxu0 %v848_v8  ;;  %275 = vmatpush1.bf16.msra.mxu1 %v848_v8 }
  0x17   :  { %159 = vmatprep.subr.bf16.mxu0 %v779_v0  ;;  %276 = vmatprep.subr.bf16.mxu1 %v779_v0 }
  0x1a   :  { %160 = vmatpush1.bf16.msra.mxu0 %v857_v9  ;;  %277 = vmatpush1.bf16.msra.mxu1 %v857_v9 }
  0x1b   :  { %161 = vmatprep.subr.bf16.mxu0 %v779_v0  ;;  %278 = vmatprep.subr.bf16.mxu1 %v779_v0 }
  0x1e   :  { %162 = vmatpush1.bf16.msra.mxu0 %v866_v10  ;;  %279 = vmatpush1.bf16.msra.mxu1 %v866_v10 }
  0x1f   :  { %163 = vmatprep.subr.bf16.mxu0 %v779_v0  ;;  %280 = vmatprep.subr.bf16.mxu1 %v779_v0 }
  0x22   :  { %164 = vmatpush1.bf16.msra.mxu0 %v875_v11  ;;  %281 = vmatpush1.bf16.msra.mxu1 %v875_v11 }
  0x23   :  { %388 = vmatprep.subr.bf16.mxu0 %v779_v0  ;;  %512 = vmatprep.subr.bf16.mxu1 %v779_v0 }
  0x25   :  { %180 = vmatmul.mubr.bf16.vlgmr.msra.gmra.mrb[0].mxu0 %v735_v12  ;;  %297 = vmatmul.mubr.bf16.vlgmr.msra.gmra.mrb[0].mxu1 %v738_v13 }
  0x26   :  { %389 = vmatpush1.bf16.msra.mxu0 %v726_v1  ;;  %513 = vmatpush1.bf16.msra.mxu1 %v726_v1 }
  0x27   :  { %390 = vmatprep.subr.bf16.mxu0 %v779_v0  ;;  %514 = vmatprep.subr.bf16.mxu1 %v779_v0 }
  0x28   :  { %651 = vmatprep.mubr.msk.bf16.mxu0 %vm134_vm0, %v741_v14  ;;  %670 = vmatprep.mubr.msk.bf16.mxu1 %vm134_vm0, %v744_v15 }
  0x2a   :  { %391 = vmatpush1.bf16.msra.mxu0 %v727_v2  ;;  %515 = vmatpush1.bf16.msra.mxu1 %v727_v2 }
  0x2b   :  { %392 = vmatprep.subr.bf16.mxu0 %v779_v0  ;;  %516 = vmatprep.subr.bf16.mxu1 %v779_v0 }
  0x2d   :  { %188 = vmatmul.mubr.bf16.gmra.mrb[4].mxu0 %v743_v16  ;;  %305 = vmatmul.mubr.bf16.gmra.mrb[4].mxu1 %v746_v17 }
  0x2e   :  { %393 = vmatpush1.bf16.msra.mxu0 %v813_v3  ;;  %517 = vmatpush1.bf16.msra.mxu1 %v813_v3 }
  0x2f   :  { %394 = vmatprep.subr.bf16.mxu0 %v779_v0  ;;  %518 = vmatprep.subr.bf16.mxu1 %v779_v0 }
  0x30   :  { %652 = vmatprep.mubr.msk.bf16.mxu0 %vm134_vm0, %v747_v18  ;;  %671 = vmatprep.mubr.msk.bf16.mxu1 %vm134_vm0, %v750_v19 }
  0x32   :  { %395 = vmatpush1.bf16.msra.mxu0 %v820_v4  ;;  %519 = vmatpush1.bf16.msra.mxu1 %v820_v4 }
  0x33   :  { %396 = vmatprep.subr.bf16.mxu0 %v779_v0  ;;  %520 = vmatprep.subr.bf16.mxu1 %v779_v0 }
  0x35   :  { %196 = vmatmul.mubr.bf16.gmra.mrb[8].mxu0 %v749_v20  ;;  %313 = vmatmul.mubr.bf16.gmra.mrb[8].mxu1 %v752_v21 }
  0x36   :  { %397 = vmatpush1.bf16.msra.mxu0 %v839_v7  ;;  %521 = vmatpush1.bf16.msra.mxu1 %v839_v7 }
  0x37   :  { %398 = vmatprep.subr.bf16.mxu0 %v779_v0  ;;  %522 = vmatprep.subr.bf16.mxu1 %v779_v0 }
  0x38   :  { %653 = vmatprep.mubr.msk.bf16.mxu0 %vm134_vm0, %v640_v24  ;;  %672 = vmatprep.mubr.msk.bf16.mxu1 %vm134_vm0, %v668_v25 }
  0x3a   :  { %399 = vmatpush1.bf16.msra.mxu0 %v848_v8  ;;  %523 = vmatpush1.bf16.msra.mxu1 %v848_v8 }
  0x3b   :  { %400 = vmatprep.subr.bf16.mxu0 %v779_v0  ;;  %524 = vmatprep.subr.bf16.mxu1 %v779_v0 }
  0x3d   :  { %204 = vmatmul.mubr.bf16.gmra.mrb[12].mxu0 %v639_v26  ;;  %321 = vmatmul.mubr.bf16.gmra.mrb[12].mxu1 %v667_v27 }
  0x3e   :  { %401 = vmatpush1.bf16.msra.mxu0 %v857_v9  ;;  %525 = vmatpush1.bf16.msra.mxu1 %v857_v9 }
  0x3f   :  { %402 = vmatprep.subr.bf16.mxu0 %v779_v0  ;;  %526 = vmatprep.subr.bf16.mxu1 %v779_v0 }
  0x40   :  { %688 = vmatprep.mubr.msk.bf16.mxu0 %vm134_vm0, %v759_v28  ;;  %707 = vmatprep.mubr.msk.bf16.mxu1 %vm134_vm0, %v762_v29 }
  0x42   :  { %403 = vmatpush1.bf16.msra.mxu0 %v866_v10  ;;  %527 = vmatpush1.bf16.msra.mxu1 %v866_v10 }
  0x43   :  { %404 = vmatprep.subr.bf16.mxu0 %v779_v0  ;;  %528 = vmatprep.subr.bf16.mxu1 %v779_v0 }
  0x46   :  { %405 = vmatpush1.bf16.msra.mxu0 %v875_v11  ;;  %529 = vmatpush1.bf16.msra.mxu1 %v875_v11 }
  0x49   :  { %421 = vmatmul.mubr.bf16.vlgmr.msra.gmra.mrb[16].mxu0 %v757_v30  ;;  %545 = vmatmul.mubr.bf16.vlgmr.msra.gmra.mrb[16].mxu1 %v760_v31 }
  0x4a   :  { %689 = vmatprep.mubr.msk.bf16.mxu0 %vm134_vm0, %v763_v32  ;;  %708 = vmatprep.mubr.msk.bf16.mxu1 %vm134_vm0, %v765_v33 }
  0x51   :  { %429 = vmatmul.mubr.bf16.gmra.mrb[20].mxu0 %v767_v34  ;;  %553 = vmatmul.mubr.bf16.gmra.mrb[20].mxu1 %v768_v35 }
  0x52   :  { %690 = vmatprep.mubr.msk.bf16.mxu0 %vm134_vm0, %v769_v36  ;;  %709 = vmatprep.mubr.msk.bf16.mxu1 %vm134_vm0, %v771_v37 }
  0x59   :  { %437 = vmatmul.mubr.bf16.gmra.mrb[24].mxu0 %v773_v40  ;;  %561 = vmatmul.mubr.bf16.gmra.mrb[24].mxu1 %v774_v41 }
  0x5a   :  { %691 = vmatprep.mubr.msk.bf16.mxu0 %vm134_vm0, %v687_v42  ;;  %710 = vmatprep.mubr.msk.bf16.mxu1 %vm134_vm0, %v706_v43 }
  0x61   :  { %445 = vmatmul.mubr.bf16.gmra.mrb[28].mxu0 %v686_v44  ;;  %569 = vmatmul.mubr.bf16.gmra.mrb[28].mxu1 %v705_v45 }
  0xf8   :  { %v181_v47 = vpop.f32.mrb[0].mxu0  ;;  %v298_v48 = vpop.f32.mrb[0].mxu1 }
  0xf9   :  { %v182_v49 = vadd.f32 %v1008_v46, %v181_v47  ;;  %v299_v50 = vadd.f32 %v1008_v46, %v298_v48  ;;  %v183_v51 = vpop.f32.mrb[1].mxu0  ;;  %v300_v52 = vpop.f32.mrb[1].mxu1 }
  0xfa   :  { %v184_v53 = vpop.f32.mrb[2].mxu0  ;;  %v301_v54 = vpop.f32.mrb[2].mxu1 }
  0xfb   :  { %v328_v55 = vmax.f32 %v182_v49, %v299_v50  ;;  %v185_v56 = vadd.f32 %v1008_v46, %v184_v53  ;;  %v302_v57 = vadd.f32 %v1008_v46, %v301_v54  ;;  %v186_v58 = vpop.f32.mrb[3].mxu0  ;;  %v303_v59 = vpop.f32.mrb[3].mxu1 }
  0xfd   :  { %v329_v60 = vmax.f32 %v185_v56, %v302_v57 }
 0x100   :  { %v189_v61 = vpop.f32.mrb[4].mxu0  ;;  %v306_v62 = vpop.f32.mrb[4].mxu1 }
 0x101   :  { %v1015_v63 = vadd.f32 %v1008_v46, %v189_v61  ;;  %v191_v0 = vpop.f32.mrb[5].mxu0  ;;  %v1018_v1 = vadd.f32 %v1008_v46, %v306_v62  ;;  %v308_v2 = vpop.f32.mrb[5].mxu1 }
 0x102   :  { %v192_v3 = vpop.f32.mrb[6].mxu0  ;;  %v309_v4 = vpop.f32.mrb[6].mxu1 }
 0x103   :  { %v330_v5 = vmax.f32 %v1015_v63, %v1018_v1  ;;  %v1023_v6 = vadd.f32 %v1008_v46, %v192_v3  ;;  %v194_v7 = vpop.f32.mrb[7].mxu0  ;;  %v1026_v8 = vadd.f32 %v1008_v46, %v309_v4  ;;  %v311_v9 = vpop.f32.mrb[7].mxu1 }
 0x105   :  { %v331_v10 = vmax.f32 %v1023_v6, %v1026_v8 }
 0x108   :  { %v197_v11 = vpop.f32.mrb[8].mxu0  ;;  %v314_v12 = vpop.f32.mrb[8].mxu1 }
 0x109   :  { %v1031_v13 = vadd.f32 %v1008_v46, %v197_v11  ;;  %v199_v14 = vpop.f32.mrb[9].mxu0  ;;  %v1034_v15 = vadd.f32 %v1008_v46, %v314_v12  ;;  %v316_v16 = vpop.f32.mrb[9].mxu1 }
 0x10a   :  { %v200_v17 = vpop.f32.mrb[10].mxu0  ;;  %v317_v18 = vpop.f32.mrb[10].mxu1 }
 0x10b   :  { %v332_v19 = vmax.f32 %v1031_v13, %v1034_v15  ;;  %v1039_v20 = vadd.f32 %v1008_v46, %v200_v17  ;;  %v202_v21 = vpop.f32.mrb[11].mxu0  ;;  %v1042_v22 = vadd.f32 %v1008_v46, %v317_v18  ;;  %v319_v23 = vpop.f32.mrb[11].mxu1 }
 0x10d   :  { %v333_v24 = vmax.f32 %v1039_v20, %v1042_v22 }
 0x110   :  { %v205_v25 = vpop.f32.mrb[12].mxu0  ;;  %v322_v26 = vpop.f32.mrb[12].mxu1 }
 0x111   :  { %v1047_v27 = vadd.f32 %v1008_v46, %v205_v25  ;;  %v207_v28 = vpop.f32.mrb[13].mxu0  ;;  %v1050_v29 = vadd.f32 %v1008_v46, %v322_v26  ;;  %v324_v30 = vpop.f32.mrb[13].mxu1 }
 0x112   :  { %v208_v31 = vpop.f32.mrb[14].mxu0  ;;  %v325_v32 = vpop.f32.mrb[14].mxu1 }
 0x113   :  { %v334_v33 = vmax.f32 %v1047_v27, %v1050_v29  ;;  %v209_v34 = vpop.f32.mrb[15].mxu0  ;;  %v326_v35 = vpop.f32.mrb[15].mxu1 }
 0x11c   :  { %v422_v36 = vpop.f32.mrb[16].mxu0  ;;  %v546_v37 = vpop.f32.mrb[16].mxu1 }
 0x11d   :  { %v423_v38 = vadd.f32 %v1008_v46, %v422_v36  ;;  %v547_v39 = vadd.f32 %v1008_v46, %v546_v37  ;;  %v424_v40 = vpop.f32.mrb[17].mxu0  ;;  %v548_v41 = vpop.f32.mrb[17].mxu1 }
 0x11e   :  { %v425_v42 = vpop.f32.mrb[18].mxu0  ;;  %v549_v43 = vpop.f32.mrb[18].mxu1 }
 0x11f   :  { %v452_v44 = vmax.f32 %v328_v55, %v423_v38  ;;  %v426_v45 = vadd.f32 %v1008_v46, %v425_v42  ;;  %v427_v47 = vpop.f32.mrb[19].mxu0  ;;  %v551_v48 = vpop.f32.mrb[19].mxu1  ;;  %v550_v51 = vadd.f32 %v1008_v46, %v549_v43 }
 0x121   :  { %v576_v49 = vmax.f32 %v452_v44, %v547_v39  ;;  %v453_v50 = vmax.f32 %v329_v60, %v426_v45 }
 0x123   :  { %v583_v52 = vmax.f32 %v576_v49, 0.0  ;;  %v577_v53 = vmax.f32 %v453_v50, %v550_v51 }
 0x124   :  { %v430_v54 = vpop.f32.mrb[20].mxu0  ;;  %v554_v56 = vpop.f32.mrb[20].mxu1 }
 0x125   :  { %v718_v57 = vpack.c.bf16 %v583_v52, %v583_v52  ;;  %v584_v58 = vmax.f32 %v577_v53, 0.0  ;;  %v431_v59 = vadd.f32 %v1008_v46, %v430_v54  ;;  %v555_v61 = vadd.f32 %v1008_v46, %v554_v56  ;;  %v432_v55 = vpop.f32.mrb[21].mxu0  ;;  %v556_v62 = vpop.f32.mrb[21].mxu1 }
 0x126   :  { %v433_v63 = vpop.f32.mrb[22].mxu0  ;;  %v557_v0 = vpop.f32.mrb[22].mxu1 }
 0x127   :  { %620 = vst.msk [vmem:[%s1110_s3] sm:$0xf] %vm619_vm1, %v718_v57  ;;  %v719_v60 = vpack.c.bf16 %v584_v58, %v584_v58  ;;  %v454_v1 = vmax.f32 %v330_v5, %v431_v59  ;;  %v434_v2 = vadd.f32 %v1008_v46, %v433_v63  ;;  %v435_v3 = vpop.f32.mrb[23].mxu0  ;;  %v559_v4 = vpop.f32.mrb[23].mxu1  ;;  %v558_v11 = vadd.f32 %v1008_v46, %v557_v0 }
 0x129   :  { %621 = vst.msk [vmem:[%s1110_s3 + $0x4] sm:$0xf] %vm619_vm1, %v719_v60  ;;  %v578_v7 = vmax.f32 %v454_v1, %v555_v61  ;;  %v455_v9 = vmax.f32 %v331_v10, %v434_v2 }
 0x12b   :  { %v585_v12 = vmax.f32 %v578_v7, 0.0  ;;  %v579_v14 = vmax.f32 %v455_v9, %v558_v11 }
 0x12c   :  { %v438_v16 = vpop.f32.mrb[24].mxu0  ;;  %v562_v5 = vpop.f32.mrb[24].mxu1 }
 0x12d   :  { %v720_v17 = vpack.c.bf16 %v585_v12, %v585_v12  ;;  %v586_v18 = vmax.f32 %v579_v14, 0.0  ;;  %v439_v21 = vadd.f32 %v1008_v46, %v438_v16  ;;  %v563_v23 = vadd.f32 %v1008_v46, %v562_v5  ;;  %v440_v25 = vpop.f32.mrb[25].mxu0  ;;  %v564_v26 = vpop.f32.mrb[25].mxu1 }
 0x12e   :  { %v441_v28 = vpop.f32.mrb[26].mxu0  ;;  %v565_v30 = vpop.f32.mrb[26].mxu1 }
 0x12f   :  { %622 = vst.msk [vmem:[%s1110_s3 + $0x8] sm:$0xf] %vm619_vm1, %v720_v17  ;;  %v721_v6 = vpack.c.bf16 %v586_v18, %v586_v18  ;;  %v456_v8 = vmax.f32 %v332_v19, %v439_v21  ;;  %v442_v10 = vadd.f32 %v1008_v46, %v441_v28  ;;  %v443_v31 = vpop.f32.mrb[27].mxu0  ;;  %v567_v32 = vpop.f32.mrb[27].mxu1  ;;  %v566_v36 = vadd.f32 %v1008_v46, %v565_v30 }
 0x131   :  { %623 = vst.msk [vmem:[%s1110_s3 + $0xc] sm:$0xf] %vm619_vm1, %v721_v6  ;;  %v580_v34 = vmax.f32 %v456_v8, %v563_v23  ;;  %v457_v35 = vmax.f32 %v333_v24, %v442_v10 }
 0x133   :  { %v587_v37 = vmax.f32 %v580_v34, 0.0  ;;  %v581_v38 = vmax.f32 %v457_v35, %v566_v36 }
 0x134   :  { %v446_v13 = vpop.f32.mrb[28].mxu0  ;;  %v570_v15 = vpop.f32.mrb[28].mxu1 }
 0x135   :  { %v722_v19 = vpack.c.bf16 %v587_v37, %v587_v37  ;;  %v588_v39 = vmax.f32 %v581_v38, 0.0  ;;  %v447_v40 = vadd.f32 %v1008_v46, %v446_v13  ;;  %v571_v41 = vadd.f32 %v1008_v46, %v570_v15  ;;  %v448_v42 = vpop.f32.mrb[29].mxu0  ;;  %v572_v43 = vpop.f32.mrb[29].mxu1 }
 0x136   :  { %v449_v44 = vpop.f32.mrb[30].mxu0  ;;  %v573_v45 = vpop.f32.mrb[30].mxu1 }
 0x137   :  { %624 = vst.msk [vmem:[%s1110_s3 + $0x10] sm:$0xf] %vm619_vm1, %v722_v19  ;;  %v723_v20 = vpack.c.bf16 %v588_v39, %v588_v39  ;;  %v458_v22 = vmax.f32 %v334_v33, %v447_v40  ;;  %v450_v24 = vpop.f32.mrb[31].mxu0  ;;  %v574_v47 = vpop.f32.mrb[31].mxu1 }
 0x139   :  { %625 = vst.msk [vmem:[%s1110_s3 + $0x14] sm:$0xf] %vm619_vm1, %v723_v20  ;;  %v582_v46 = vmax.f32 %v458_v22, %v571_v41 }
 0x13b   :  { %v589_v48 = vmax.f32 %v582_v46, 0.0 }
 0x13d   :  { %v724_v49 = vpack.c.bf16 %v589_v48, %v589_v48 }
 0x13f   :  { %627 = vst.msk [vmem:[%s1110_s3 + $0x18] sm:$0x1] %vm626_vm2, %v724_v49 }

</bundles_post_ra>
